<compile_context>
chip_gen: v7x
topology: tpu7x:2x2x1
jax: 0.10.0
libtpu: 0.0.40
codegen_flags: <defaults>
</compile_context>

<pallas_src>
import functools

import jax
import jax.numpy as jnp
from jax.experimental import pallas as pl
from jax.experimental.pallas import tpu as pltpu


def bottleneck_kernel(x_ref, w1_ref, b1_ref, w2_ref, b2_ref, w3_ref, b3_ref,
                      o_ref, col_ref, *, W):
    # x_ref   : (1, H+2, Wp, Cp)     bf16  whole padded image (resident per batch)
    # w1_ref  : (Cp, Pp)             bf16  conv1 weight, BN1 scale folded in
    # w2_ref  : (3, 3*Pp, Pp)        bf16  conv2 weight; dim1 = (kx, cin)
    # w3_ref  : (Pp, C4p)            bf16  conv3 weight, BN3 scale folded in
    # b*_ref  : (1, Pp / C4p)        f32   folded BN biases
    # o_ref   : (1, TH, Wp, C4p)     f32
    # col_ref : (TH+2, Wp, 3*Pp)     bf16  dx-only im2col scratch (kx slabs on lanes)
    # W       : static real (unpadded) image width
    th = pl.program_id(1)
    nt = pl.num_programs(1)
    TH = o_ref.shape[1]
    Wp = o_ref.shape[2]
    Cp = x_ref.shape[3]
    Pp = w1_ref.shape[1]
    C4p = w3_ref.shape[1]

    row0 = pl.multiple_of(th * TH, TH)

    # ---- conv1 (1x1) + bn1 + relu on TH+2 rows (1-row halo is recomputed) ----
    xh = x_ref[:, pl.ds(row0, TH + 2), :, :]                  # (1, TH+2, Wp, Cp) bf16
    xf = xh.reshape((TH + 2) * Wp, Cp)
    h1 = jnp.dot(xf, w1_ref[...], preferred_element_type=jnp.float32)
    h1 = jnp.maximum(h1 + b1_ref[...], 0.0)                   # ((TH+2)*Wp, Pp) f32
    h1b = h1.astype(jnp.bfloat16).reshape(TH + 2, Wp, Pp)

    # ---- conv2 (3x3, SAME): dx-only im2col (3 lane slabs), 3 dy matmuls ------
    # kx=1 (center): aligned full store.
    col_ref[:, :, Pp:2 * Pp] = h1b
    # kx=0 (left neighbor, value h1(yy, x-1)); x=0 reads the zero W-boundary.
    col_ref[:, 1:Wp, 0:Pp] = h1b[:, 0:Wp - 1, :]
    col_ref[:, 0:1, 0:Pp] = jnp.zeros((TH + 2, 1, Pp), jnp.bfloat16)
    # kx=2 (right neighbor, value h1(yy, x+1)); columns >= W-1 read zeros
    # (image right boundary; also kills the relu(b1) leak from W padding).
    col_ref[:, 0:W - 1, 2 * Pp:3 * Pp] = h1b[:, 1:W, :]
    col_ref[:, W - 1:Wp, 2 * Pp:3 * Pp] = jnp.zeros((TH + 2, Wp - W + 1, Pp),
                                                    jnp.bfloat16)

    # Out-of-image halo rows (they carry relu(b1) from the wrapper's zero-pad
    # rows) must be exactly zero.  Only the boundary row tiles pay for this.
    @pl.when(th == 0)
    def _():
        col_ref[0:1, :, :] = jnp.zeros((1, Wp, 3 * Pp), jnp.bfloat16)

    @pl.when(th == nt - 1)
    def _():
        col_ref[TH + 1:TH + 2, :, :] = jnp.zeros((1, Wp, 3 * Pp), jnp.bfloat16)

    KK = 3 * Pp
    h2 = jnp.dot(col_ref[0:TH, :, :].reshape(TH * Wp, KK), w2_ref[0],
                 preferred_element_type=jnp.float32)
    h2 = h2 + jnp.dot(col_ref[1:TH + 1, :, :].reshape(TH * Wp, KK), w2_ref[1],
                      preferred_element_type=jnp.float32)
    h2 = h2 + jnp.dot(col_ref[2:TH + 2, :, :].reshape(TH * Wp, KK), w2_ref[2],
                      preferred_element_type=jnp.float32)
    h2 = jnp.maximum(h2 + b2_ref[...], 0.0)                   # (TH*Wp, Pp) f32

    # ---- conv3 (1x1) + bn3 + identity residual + relu ------------------------
    h3 = jnp.dot(h2.astype(jnp.bfloat16), w3_ref[...],
                 preferred_element_type=jnp.float32) + b3_ref[...]
    res = x_ref[:, pl.ds(row0 + 1, TH), :, :].reshape(TH * Wp, C4p)
    out = jnp.maximum(h3 + res.astype(jnp.float32), 0.0)
    o_ref[...] = out.reshape(1, TH, Wp, C4p).astype(o_ref.dtype)


def bottleneck_pallas(x_nhwc, w1, s1, b1, w2, s2, b2, w3, s3, b3, *, row_tile=8):
    # row_tile: 8 keeps >=2 row tiles per batch for typical ResNet shapes (keeps
    # both v7x TensorCores busy); 16-32 amortizes the halo better on v5e/v6e
    # (128 MiB VMEM) if the grid stays large enough.
    N, H, W, Cin = x_nhwc.shape
    P = w1.shape[1]
    C4 = w3.shape[1]
    assert C4 == Cin, "identity residual requires inplanes == planes * 4"

    # Largest divisor of H that is <= row_tile (never fall back to TH=H unless
    # H itself is small), so scratch never scales with the full image height.
    TH = 1
    for d in range(1, min(row_tile, H) + 1):
        if H % d == 0:
            TH = d

    LANE, SUB = 128, 8

    def rup(v, m):
        return ((v + m - 1) // m) * m

    Cp, Pp, C4p = rup(Cin, LANE), rup(P, LANE), rup(C4, LANE)
    Wp = rup(W, SUB)

    # Fold BN scale into the conv weights (per output channel), pad channels to
    # lane multiples, cast to bf16.  Biases stay f32.
    w1f = w1 * s1                                             # (Cin, P)
    w2f = w2 * s2.reshape(1, 1, 1, P)                         # (3, 3, P, P)
    w3f = w3 * s3                                             # (P, C4)

    w1p = jnp.zeros((Cp, Pp), jnp.float32).at[:Cin, :P].set(w1f).astype(jnp.bfloat16)
    w2p = jnp.zeros((3, 3, Pp, Pp), jnp.float32).at[:, :, :P, :P].set(w2f)
    w2p = w2p.reshape(3, 3 * Pp, Pp).astype(jnp.bfloat16)     # dim1 = (kx, cin)
    w3p = jnp.zeros((Pp, C4p), jnp.float32).at[:P, :C4].set(w3f).astype(jnp.bfloat16)

    b1p = jnp.zeros((1, Pp), jnp.float32).at[:, :P].set(b1)
    b2p = jnp.zeros((1, Pp), jnp.float32).at[:, :P].set(b2)
    b3p = jnp.zeros((1, C4p), jnp.float32).at[:, :C4].set(b3)

    # Pad: 1 zero row each side of H (3x3 halo), W to a sublane multiple,
    # channels to lane multiples; carry x as bf16 (residual add is bf16 vs f32).
    xp = jnp.pad(x_nhwc, ((0, 0), (1, 1), (0, Wp - W), (0, Cp - Cin)))
    xp = xp.astype(jnp.bfloat16)

    # VMEM budget: double-buffered blocks + weights + im2col scratch.
    est = (2 * (H + 2) * Wp * Cp * 2              # x block (bf16)
           + 2 * TH * Wp * C4p * 4                # out block (f32)
           + 2 * 2 * (Cp * Pp + 9 * Pp * Pp + Pp * C4p)   # weights (bf16)
           + 2 * 4 * (2 * Pp + C4p)               # biases (f32)
           + (TH + 2) * Wp * 3 * Pp * 2)          # col scratch (bf16)
    try:
        vmem_cap = int(pltpu.get_tpu_info().vmem_capacity_bytes)
        if vmem_cap <= 0:
            raise ValueError
    except Exception:
        vmem_cap = 64 * 2 ** 20                   # v7x-safe fallback
    vmem_limit = int(min(max(2 * est, 16 * 2 ** 20), (3 * vmem_cap) // 4))

    kernel = functools.partial(bottleneck_kernel, W=W)

    out_padded = pl.pallas_call(
        kernel,
        out_shape=jax.ShapeDtypeStruct((N, H, Wp, C4p), jnp.float32),
        grid_spec=pltpu.PrefetchScalarGridSpec(
            num_scalar_prefetch=0,
            grid=(N, H // TH),
            in_specs=[
                pl.BlockSpec((1, H + 2, Wp, Cp), lambda n, t: (n, 0, 0, 0)),
                pl.BlockSpec((Cp, Pp), lambda n, t: (0, 0)),
                pl.BlockSpec((1, Pp), lambda n, t: (0, 0)),
                pl.BlockSpec((3, 3 * Pp, Pp), lambda n, t: (0, 0, 0)),
                pl.BlockSpec((1, Pp), lambda n, t: (0, 0)),
                pl.BlockSpec((Pp, C4p), lambda n, t: (0, 0)),
                pl.BlockSpec((1, C4p), lambda n, t: (0, 0)),
            ],
            out_specs=pl.BlockSpec((1, TH, Wp, C4p), lambda n, t: (n, t, 0, 0)),
            scratch_shapes=[
                pltpu.VMEM((TH + 2, Wp, 3 * Pp), jnp.bfloat16),
            ],
        ),
        compiler_params=pltpu.CompilerParams(
            dimension_semantics=("parallel", "parallel"),
            vmem_limit_bytes=vmem_limit),
    )(xp, w1p, b1p, w2p, b2p, w3p, b3p)

    return out_padded[:, :, :W, :C4]


def bottleneck_ref(x_nhwc, w1, s1, b1, w2, s2, b2, w3, s3, b3):
    """Pure-JAX f32 reference (same NHWC math) for a correctness check."""
    def conv1x1(x, w):
        return jnp.einsum('nhwc,cd->nhwd', x, w)

    def conv3x3(x, w):
        return jax.lax.conv_general_dilated(
            x, w, window_strides=(1, 1), padding='SAME',
            dimension_numbers=('NHWC', 'HWIO', 'NHWC'))

    h = jnp.maximum(conv1x1(x_nhwc, w1) * s1 + b1, 0.0)
    h = jnp.maximum(conv3x3(h, w2) * s2 + b2, 0.0)
    h = conv1x1(h, w3) * s3 + b3
    return jnp.maximum(h + x_nhwc, 0.0)


def fold_bn(gamma, beta, mean, var, eps=1e-5):
    scale = gamma / jnp.sqrt(var + eps)
    bias = beta - mean * scale
    return scale.reshape(1, -1), bias.reshape(1, -1)


if __name__ == "__main__":
    # Small shapes consistent with the module: inplanes = planes * expansion.
    N, H, W = 2, 16, 16
    planes = 4
    inplanes = planes * 4          # 16, so the identity residual is valid
    C4 = planes * 4

    key = jax.random.PRNGKey(0)
    ks = jax.random.split(key, 16)

    # Input (PyTorch convention NCHW), converted to NHWC for the kernel.
    x_nchw = jax.random.normal(ks[0], (N, inplanes, H, W), jnp.float32)
    x_nhwc = jnp.transpose(x_nchw, (0, 2, 3, 1))

    # Conv weights (deterministic, kaiming-style scaling).
    w1 = jax.random.normal(ks[1], (inplanes, planes), jnp.float32) * (2.0 / inplanes) ** 0.5
    w2 = jax.random.normal(ks[2], (3, 3, planes, planes), jnp.float32) * (2.0 / (9 * planes)) ** 0.5
    w3 = jax.random.normal(ks[3], (planes, C4), jnp.float32) * (2.0 / planes) ** 0.5

    # Synthetic BatchNorm parameters (eval mode), folded to scale/bias.
    def bn_params(k, c):
        k1, k2, k3, k4 = jax.random.split(k, 4)
        gamma = 1.0 + 0.1 * jax.random.normal(k1, (c,), jnp.float32)
        beta = 0.1 * jax.random.normal(k2, (c,), jnp.float32)
        mean = 0.1 * jax.random.normal(k3, (c,), jnp.float32)
        var = jax.random.uniform(k4, (c,), jnp.float32, 0.5, 1.5)
        return fold_bn(gamma, beta, mean, var)

    s1, b1 = bn_params(ks[4], planes)
    s2, b2 = bn_params(ks[5], planes)
    s3, b3 = bn_params(ks[6], C4)

    out_nhwc = bottleneck_pallas(x_nhwc, w1, s1, b1, w2, s2, b2, w3, s3, b3)
    out_nhwc = jax.block_until_ready(out_nhwc)
    out_nchw = jnp.transpose(out_nhwc, (0, 3, 1, 2))   # back to PyTorch layout

    ref_nhwc = bottleneck_ref(x_nhwc, w1, s1, b1, w2, s2, b2, w3, s3, b3)
    assert out_nchw.shape == (N, C4, H, W)
    max_err = float(jnp.max(jnp.abs(out_nhwc - ref_nhwc)))
    # bf16 MXU inputs + bf16 residual carry with f32 accumulation -> loose tol.
    assert jnp.allclose(out_nhwc, ref_nhwc, atol=1e-1, rtol=5e-2), max_err

    print("KERNEL_OK")
</pallas_src>

<mosaic_0001>
module attributes {stable_mosaic.version = 11 : i64} {
  func.func @bottleneck_kernel(%arg0: i32, %arg1: i32, %arg2: memref<1x18x16x128xbf16, #tpu.memory_space<vmem>>, %arg3: memref<128x128xbf16, #tpu.memory_space<vmem>>, %arg4: memref<1x128xf32, #tpu.memory_space<vmem>>, %arg5: memref<3x384x128xbf16, #tpu.memory_space<vmem>>, %arg6: memref<1x128xf32, #tpu.memory_space<vmem>>, %arg7: memref<128x128xbf16, #tpu.memory_space<vmem>>, %arg8: memref<1x128xf32, #tpu.memory_space<vmem>>, %arg9: memref<1x8x16x128xf32, #tpu.memory_space<vmem>>, %arg10: memref<10x16x384xbf16, #tpu.memory_space<vmem>>) attributes {dimension_semantics = [#tpu.dimension_semantics<parallel>, #tpu.dimension_semantics<parallel>], iteration_bounds = array<i64: 2, 2>, scalar_prefetch = 0 : i64, scratch_operands = 1 : i64, tpu.core_type = #tpu.core_type<tc>, window_params = [{transform_indices = @transform_0, window_bounds = array<i64: 1, 18, 16, 128>}, {pipeline_mode = #tpu.pipeline_mode<synchronous>, transform_indices = @transform_1, window_bounds = array<i64: 128, 128>}, {pipeline_mode = #tpu.pipeline_mode<synchronous>, transform_indices = @transform_2, window_bounds = array<i64: 1, 128>}, {pipeline_mode = #tpu.pipeline_mode<synchronous>, transform_indices = @transform_3, window_bounds = array<i64: 3, 384, 128>}, {pipeline_mode = #tpu.pipeline_mode<synchronous>, transform_indices = @transform_4, window_bounds = array<i64: 1, 128>}, {pipeline_mode = #tpu.pipeline_mode<synchronous>, transform_indices = @transform_5, window_bounds = array<i64: 128, 128>}, {pipeline_mode = #tpu.pipeline_mode<synchronous>, transform_indices = @transform_6, window_bounds = array<i64: 1, 128>}, {transform_indices = @transform_7, window_bounds = array<i64: 1, 8, 16, 128>}]} {
    %c8_i32 = arith.constant 8 : i32
    %0 = arith.muli %arg1, %c8_i32 : i32
    %1 = tpu.assume_multiple %0, 8 : i32
    %c0 = arith.constant 0 : index
    %2 = arith.index_cast %1 : i32 to index
    %c0_0 = arith.constant 0 : index
    %c0_1 = arith.constant 0 : index
    %3 = vector.load %arg2[%c0, %2, %c0_0, %c0_1] : memref<1x18x16x128xbf16, #tpu.memory_space<vmem>>, vector<1x10x16x128xbf16>
    %4 = vector.shape_cast %3 : vector<1x10x16x128xbf16> to vector<160x128xbf16>
    %c0_2 = arith.constant 0 : index
    %c0_3 = arith.constant 0 : index
    %5 = vector.load %arg3[%c0_2, %c0_3] : memref<128x128xbf16, #tpu.memory_space<vmem>>, vector<128x128xbf16>
    %cst = arith.constant dense<0.000000e+00> : vector<160x128xf32>
    %6 = tpu.matmul %4, %5, %cst {dimension_numbers = #tpu.dot_dimension_numbers<[1], [0], [0], [1], [0, 0, 1, 1], [], []>} : vector<160x128xbf16>, vector<128x128xbf16>, vector<160x128xf32> -> vector<160x128xf32>
    %c0_4 = arith.constant 0 : index
    %c0_5 = arith.constant 0 : index
    %7 = vector.load %arg4[%c0_4, %c0_5] : memref<1x128xf32, #tpu.memory_space<vmem>>, vector<1x128xf32>
    %8 = vector.broadcast %7 : vector<1x128xf32> to vector<160x128xf32>
    %9 = arith.addf %6, %8 : vector<160x128xf32>
    %cst_6 = arith.constant 0.000000e+00 : f32
    %10 = vector.broadcast %cst_6 : f32 to vector<160x128xf32>
    %11 = arith.maximumf %9, %10 : vector<160x128xf32>
    %12 = arith.truncf %11 : vector<160x128xf32> to vector<160x128xbf16>
    %13 = vector.shape_cast %12 : vector<160x128xbf16> to vector<10x16x128xbf16>
    %c0_7 = arith.constant 0 : index
    %c0_8 = arith.constant 0 : index
    %c128 = arith.constant 128 : index
    %14 = vector.load %arg10[%c0_7, %c0_8, %c128] : memref<10x16x384xbf16, #tpu.memory_space<vmem>>, vector<10x16x128xbf16>
    tpu.vector_store %arg10[%c0_7, %c0_8, %c128], %13 {strides = array<i32>} : memref<10x16x384xbf16, #tpu.memory_space<vmem>>, vector<10x16x128xbf16>,
    %15 = vector.extract_strided_slice %13 {offsets = [0, 0, 0], sizes = [10, 15, 128], strides = [1, 1, 1]} : vector<10x16x128xbf16> to vector<10x15x128xbf16>
    %c0_9 = arith.constant 0 : index
    %c1 = arith.constant 1 : index
    %c0_10 = arith.constant 0 : index
    %16 = vector.load %arg10[%c0_9, %c1, %c0_10] : memref<10x16x384xbf16, #tpu.memory_space<vmem>>, vector<10x15x128xbf16>
    tpu.vector_store %arg10[%c0_9, %c1, %c0_10], %15 {strides = array<i32>} : memref<10x16x384xbf16, #tpu.memory_space<vmem>>, vector<10x15x128xbf16>,
    %cst_11 = arith.constant 0.000000e+00 : bf16
    %17 = vector.broadcast %cst_11 : bf16 to vector<10x1x128xbf16>
    %c0_12 = arith.constant 0 : index
    %c0_13 = arith.constant 0 : index
    %c0_14 = arith.constant 0 : index
    %18 = vector.load %arg10[%c0_12, %c0_13, %c0_14] : memref<10x16x384xbf16, #tpu.memory_space<vmem>>, vector<10x1x128xbf16>
    tpu.vector_store %arg10[%c0_12, %c0_13, %c0_14], %17 {strides = array<i32>} : memref<10x16x384xbf16, #tpu.memory_space<vmem>>, vector<10x1x128xbf16>,
    %19 = vector.extract_strided_slice %13 {offsets = [0, 1, 0], sizes = [10, 15, 128], strides = [1, 1, 1]} : vector<10x16x128xbf16> to vector<10x15x128xbf16>
    %c0_15 = arith.constant 0 : index
    %c0_16 = arith.constant 0 : index
    %c256 = arith.constant 256 : index
    %20 = vector.load %arg10[%c0_15, %c0_16, %c256] : memref<10x16x384xbf16, #tpu.memory_space<vmem>>, vector<10x15x128xbf16>
    tpu.vector_store %arg10[%c0_15, %c0_16, %c256], %19 {strides = array<i32>} : memref<10x16x384xbf16, #tpu.memory_space<vmem>>, vector<10x15x128xbf16>,
    %cst_17 = arith.constant 0.000000e+00 : bf16
    %21 = vector.broadcast %cst_17 : bf16 to vector<10x1x128xbf16>
    %c0_18 = arith.constant 0 : index
    %c15 = arith.constant 15 : index
    %c256_19 = arith.constant 256 : index
    %22 = vector.load %arg10[%c0_18, %c15, %c256_19] : memref<10x16x384xbf16, #tpu.memory_space<vmem>>, vector<10x1x128xbf16>
    tpu.vector_store %arg10[%c0_18, %c15, %c256_19], %21 {strides = array<i32>} : memref<10x16x384xbf16, #tpu.memory_space<vmem>>, vector<10x1x128xbf16>,
    %c0_i32 = arith.constant 0 : i32
    %23 = arith.cmpi eq, %arg1, %c0_i32 : i32
    %24 = arith.extui %23 : i1 to i32
    %c0_i32_20 = arith.constant 0 : i32
    %25 = arith.cmpi ne, %24, %c0_i32_20 : i32
    scf.if %25 {
      %cst_59 = arith.constant 0.000000e+00 : bf16
      %67 = vector.broadcast %cst_59 : bf16 to vector<1x16x384xbf16>
      %c0_60 = arith.constant 0 : index
      %c0_61 = arith.constant 0 : index
      %c0_62 = arith.constant 0 : index
      %68 = vector.load %arg10[%c0_60, %c0_61, %c0_62] : memref<10x16x384xbf16, #tpu.memory_space<vmem>>, vector<1x16x384xbf16>
      tpu.vector_store %arg10[%c0_60, %c0_61, %c0_62], %67 {strides = array<i32>} : memref<10x16x384xbf16, #tpu.memory_space<vmem>>, vector<1x16x384xbf16>,
    } else {
    }
    %c1_i32 = arith.constant 1 : i32
    %26 = arith.cmpi eq, %arg1, %c1_i32 : i32
    %27 = arith.extui %26 : i1 to i32
    %c0_i32_21 = arith.constant 0 : i32
    %28 = arith.cmpi ne, %27, %c0_i32_21 : i32
    scf.if %28 {
      %cst_59 = arith.constant 0.000000e+00 : bf16
      %67 = vector.broadcast %cst_59 : bf16 to vector<1x16x384xbf16>
      %c9 = arith.constant 9 : index
      %c0_60 = arith.constant 0 : index
      %c0_61 = arith.constant 0 : index
      %68 = vector.load %arg10[%c9, %c0_60, %c0_61] : memref<10x16x384xbf16, #tpu.memory_space<vmem>>, vector<1x16x384xbf16>
      tpu.vector_store %arg10[%c9, %c0_60, %c0_61], %67 {strides = array<i32>} : memref<10x16x384xbf16, #tpu.memory_space<vmem>>, vector<1x16x384xbf16>,
    } else {
    }
    %c0_22 = arith.constant 0 : index
    %c0_23 = arith.constant 0 : index
    %c0_24 = arith.constant 0 : index
    %29 = vector.load %arg10[%c0_22, %c0_23, %c0_24] : memref<10x16x384xbf16, #tpu.memory_space<vmem>>, vector<8x16x384xbf16>
    %30 = vector.shape_cast %29 : vector<8x16x384xbf16> to vector<128x384xbf16>
    %c0_25 = arith.constant 0 : index
    %c0_26 = arith.constant 0 : index
    %c0_27 = arith.constant 0 : index
    %31 = vector.load %arg5[%c0_25, %c0_26, %c0_27] : memref<3x384x128xbf16, #tpu.memory_space<vmem>>, vector<1x384x128xbf16>
    %32 = vector.shape_cast %31 : vector<1x384x128xbf16> to vector<384x128xbf16>
    %cst_28 = arith.constant dense<0.000000e+00> : vector<128x128xf32>
    %33 = tpu.matmul %30, %32, %cst_28 {dimension_numbers = #tpu.dot_dimension_numbers<[1], [0], [0], [1], [0, 0, 1, 1], [], []>} : vector<128x384xbf16>, vector<384x128xbf16>, vector<128x128xf32> -> vector<128x128xf32>
    %c1_29 = arith.constant 1 : index
    %c0_30 = arith.constant 0 : index
    %c0_31 = arith.constant 0 : index
    %34 = vector.load %arg10[%c1_29, %c0_30, %c0_31] : memref<10x16x384xbf16, #tpu.memory_space<vmem>>, vector<8x16x384xbf16>
    %35 = vector.shape_cast %34 : vector<8x16x384xbf16> to vector<128x384xbf16>
    %c1_32 = arith.constant 1 : index
    %c0_33 = arith.constant 0 : index
    %c0_34 = arith.constant 0 : index
    %36 = vector.load %arg5[%c1_32, %c0_33, %c0_34] : memref<3x384x128xbf16, #tpu.memory_space<vmem>>, vector<1x384x128xbf16>
    %37 = vector.shape_cast %36 : vector<1x384x128xbf16> to vector<384x128xbf16>
    %cst_35 = arith.constant dense<0.000000e+00> : vector<128x128xf32>
    %38 = tpu.matmul %35, %37, %cst_35 {dimension_numbers = #tpu.dot_dimension_numbers<[1], [0], [0], [1], [0, 0, 1, 1], [], []>} : vector<128x384xbf16>, vector<384x128xbf16>, vector<128x128xf32> -> vector<128x128xf32>
    %39 = arith.addf %33, %38 : vector<128x128xf32>
    %c2 = arith.constant 2 : index
    %c0_36 = arith.constant 0 : index
    %c0_37 = arith.constant 0 : index
    %40 = vector.load %arg10[%c2, %c0_36, %c0_37] : memref<10x16x384xbf16, #tpu.memory_space<vmem>>, vector<8x16x384xbf16>
    %41 = vector.shape_cast %40 : vector<8x16x384xbf16> to vector<128x384xbf16>
    %c2_38 = arith.constant 2 : index
    %c0_39 = arith.constant 0 : index
    %c0_40 = arith.constant 0 : index
    %42 = vector.load %arg5[%c2_38, %c0_39, %c0_40] : memref<3x384x128xbf16, #tpu.memory_space<vmem>>, vector<1x384x128xbf16>
    %43 = vector.shape_cast %42 : vector<1x384x128xbf16> to vector<384x128xbf16>
    %cst_41 = arith.constant dense<0.000000e+00> : vector<128x128xf32>
    %44 = tpu.matmul %41, %43, %cst_41 {dimension_numbers = #tpu.dot_dimension_numbers<[1], [0], [0], [1], [0, 0, 1, 1], [], []>} : vector<128x384xbf16>, vector<384x128xbf16>, vector<128x128xf32> -> vector<128x128xf32>
    %45 = arith.addf %39, %44 : vector<128x128xf32>
    %c0_42 = arith.constant 0 : index
    %c0_43 = arith.constant 0 : index
    %46 = vector.load %arg6[%c0_42, %c0_43] : memref<1x128xf32, #tpu.memory_space<vmem>>, vector<1x128xf32>
    %47 = vector.broadcast %46 : vector<1x128xf32> to vector<128x128xf32>
    %48 = arith.addf %45, %47 : vector<128x128xf32>
    %cst_44 = arith.constant 0.000000e+00 : f32
    %49 = vector.broadcast %cst_44 : f32 to vector<128x128xf32>
    %50 = arith.maximumf %48, %49 : vector<128x128xf32>
    %51 = arith.truncf %50 : vector<128x128xf32> to vector<128x128xbf16>
    %c0_45 = arith.constant 0 : index
    %c0_46 = arith.constant 0 : index
    %52 = vector.load %arg7[%c0_45, %c0_46] : memref<128x128xbf16, #tpu.memory_space<vmem>>, vector<128x128xbf16>
    %cst_47 = arith.constant dense<0.000000e+00> : vector<128x128xf32>
    %53 = tpu.matmul %51, %52, %cst_47 {dimension_numbers = #tpu.dot_dimension_numbers<[1], [0], [0], [1], [0, 0, 1, 1], [], []>} : vector<128x128xbf16>, vector<128x128xbf16>, vector<128x128xf32> -> vector<128x128xf32>
    %c0_48 = arith.constant 0 : index
    %c0_49 = arith.constant 0 : index
    %54 = vector.load %arg8[%c0_48, %c0_49] : memref<1x128xf32, #tpu.memory_space<vmem>>, vector<1x128xf32>
    %55 = vector.broadcast %54 : vector<1x128xf32> to vector<128x128xf32>
    %56 = arith.addf %53, %55 : vector<128x128xf32>
    %c1_i32_50 = arith.constant 1 : i32
    %57 = arith.addi %1, %c1_i32_50 : i32
    %c0_51 = arith.constant 0 : index
    %58 = arith.index_cast %57 : i32 to index
    %c0_52 = arith.constant 0 : index
    %c0_53 = arith.constant 0 : index
    %59 = vector.load %arg2[%c0_51, %58, %c0_52, %c0_53] : memref<1x18x16x128xbf16, #tpu.memory_space<vmem>>, vector<1x8x16x128xbf16>
    %60 = vector.shape_cast %59 : vector<1x8x16x128xbf16> to vector<128x128xbf16>
    %61 = arith.extf %60 : vector<128x128xbf16> to vector<128x128xf32>
    %62 = arith.addf %56, %61 : vector<128x128xf32>
    %cst_54 = arith.constant 0.000000e+00 : f32
    %63 = vector.broadcast %cst_54 : f32 to vector<128x128xf32>
    %64 = arith.maximumf %62, %63 : vector<128x128xf32>
    %65 = vector.shape_cast %64 : vector<128x128xf32> to vector<1x8x16x128xf32>
    %c0_55 = arith.constant 0 : index
    %c0_56 = arith.constant 0 : index
    %c0_57 = arith.constant 0 : index
    %c0_58 = arith.constant 0 : index
    %66 = vector.load %arg9[%c0_55, %c0_56, %c0_57, %c0_58] : memref<1x8x16x128xf32, #tpu.memory_space<vmem>>, vector<1x8x16x128xf32>
    tpu.vector_store %arg9[%c0_55, %c0_56, %c0_57, %c0_58], %65 {strides = array<i32>} : memref<1x8x16x128xf32, #tpu.memory_space<vmem>>, vector<1x8x16x128xf32>,
    return
  }
  func.func @transform_0(%arg0: i32, %arg1: i32) -> (i32, i32, i32, i32) {
    %c0_i32 = arith.constant 0 : i32
    %c0_i32_0 = arith.constant 0 : i32
    %c0_i32_1 = arith.constant 0 : i32
    %c0_i32_2 = arith.constant 0 : i32
    return %arg0, %c0_i32, %c0_i32_0, %c0_i32_1 : i32, i32, i32, i32
  }
  func.func @transform_1(%arg0: i32, %arg1: i32) -> (i32, i32) {
    %c0_i32 = arith.constant 0 : i32
    %c0_i32_0 = arith.constant 0 : i32
    %c0_i32_1 = arith.constant 0 : i32
    return %c0_i32, %c0_i32_0 : i32, i32
  }
  func.func @transform_2(%arg0: i32, %arg1: i32) -> (i32, i32) {
    %c0_i32 = arith.constant 0 : i32
    %c0_i32_0 = arith.constant 0 : i32
    %c0_i32_1 = arith.constant 0 : i32
    return %c0_i32, %c0_i32_0 : i32, i32
  }
  func.func @transform_3(%arg0: i32, %arg1: i32) -> (i32, i32, i32) {
    %c0_i32 = arith.constant 0 : i32
    %c0_i32_0 = arith.constant 0 : i32
    %c0_i32_1 = arith.constant 0 : i32
    %c0_i32_2 = arith.constant 0 : i32
    return %c0_i32, %c0_i32_0, %c0_i32_1 : i32, i32, i32
  }
  func.func @transform_4(%arg0: i32, %arg1: i32) -> (i32, i32) {
    %c0_i32 = arith.constant 0 : i32
    %c0_i32_0 = arith.constant 0 : i32
    %c0_i32_1 = arith.constant 0 : i32
    return %c0_i32, %c0_i32_0 : i32, i32
  }
  func.func @transform_5(%arg0: i32, %arg1: i32) -> (i32, i32) {
    %c0_i32 = arith.constant 0 : i32
    %c0_i32_0 = arith.constant 0 : i32
    %c0_i32_1 = arith.constant 0 : i32
    return %c0_i32, %c0_i32_0 : i32, i32
  }
  func.func @transform_6(%arg0: i32, %arg1: i32) -> (i32, i32) {
    %c0_i32 = arith.constant 0 : i32
    %c0_i32_0 = arith.constant 0 : i32
    %c0_i32_1 = arith.constant 0 : i32
    return %c0_i32, %c0_i32_0 : i32, i32
  }
  func.func @transform_7(%arg0: i32, %arg1: i32) -> (i32, i32, i32, i32) {
    %c0_i32 = arith.constant 0 : i32
    %c0_i32_0 = arith.constant 0 : i32
    %c0_i32_1 = arith.constant 0 : i32
    return %arg0, %arg1, %c0_i32, %c0_i32_0 : i32, i32, i32, i32
  }
}

</mosaic_0001>

<bundles_post_ra>
// kernel: tpu_custom_call.1
= control target key start
LH: loop header
LB: loop body
LE: loop exit
PB: predicated region body
PF: predicated region fallthrough
CT: control target
= control target key end

     0   :  { %s4635_s0 = inlined_call_operand.hbm [shape: bf16[2,18,16,128], index: 0, kind: input, shape index: {}]   ;;  %s4636_s1 = inlined_call_operand.hbm [shape: bf16[128,128], index: 1, kind: input, shape index: {}]   ;;  %s4637_s2 = inlined_call_operand.vmem [shape: f32[1,128], index: 2, kind: input, shape index: {}]   ;;  %s4638_s3 = inlined_call_operand.hbm [shape: bf16[3,384,128], index: 3, kind: input, shape index: {}]   ;;  %s4639_s4 = inlined_call_operand.vmem [shape: f32[1,128], index: 4, kind: input, shape index: {}]   ;;  %s4640_s5 = inlined_call_operand.hbm [shape: bf16[128,128], index: 5, kind: input, shape index: {}]   ;;  %s4641_s6 = inlined_call_operand.vmem [shape: f32[1,128], index: 6, kind: input, shape index: {}]   ;;  %s4642_s7 = inlined_call_operand.hbm [shape: f32[2,16,16,128], index: 7, kind: output, shape index: {}]  }
   0x1   :  { %4655 = sst [smem:[#allocation20_spill]] %s4636_s1 }
   0x2   :  { %4656 = sst [smem:[#allocation21_spill]] %s4637_s2 }
   0x3   :  { %4657 = sst [smem:[#allocation22_spill]] %s4638_s3 }
   0x4   :  { %4658 = sst [smem:[#allocation23_spill]] %s4639_s4 }
   0x5   :  { %4659 = sst [smem:[#allocation24_spill]] %s4641_s6 }
   0x6   :  { %4660 = sst [smem:[#allocation25_spill]] %s4642_s7 }
   0x7   :  { %12 = vsyncpa [#allocation4], 0 }
   0x8   :  { %14 = vsyncpa [#allocation4 + $0x1], 0 }
   0x9   :  { %15 = vsyncpa [#allocation7], 0 }
   0xa   :  { %16 = vsyncpa [#allocation10], 0 }
   0xb   :  { %17 = vsyncpa [#allocation5], 0 }
   0xc   :  { %19 = vsyncpa [#allocation5 + $0x1], 0  ;;  %s3868_s24 = smov 0   ;;  %s3870_s25 = smov 0  }
   0xd   :  { %s3872_s26 = smov 0   ;;  %s3874_s27 = smov 0  }
   0xe   :  { %s3876_s28 = smov 0   ;;  %s3878_s29 = smov 0  }
   0xf   :  { %s3880_s30 = smov 0   ;;  %s3882_s8 = smov 0  }
  0x10   :  { %s3884_s9 = smov 0   ;;  %s3886_s10 = smov 0  }
  0x11   :  { %s3888_s11 = smov 0  }
  0x12 LB: > { %4661 = sst [smem:[#allocation16_spill]] %s3775_s24  ;;  %s2609_s12 = sadd.s32 4294967295, %s3815_s11   ;;  %s3815_s11 = sphi %s3888_s11, %s25_s11   ;;  %s3811_s10 = sphi %s3886_s10, %s4709_s10   ;;  %s3807_s9 = sphi %s3884_s9, %s4708_s9   ;;  %s3803_s8 = sphi %s3882_s8, %s4707_s8   ;;  %s3799_s30 = sphi %s3880_s30, %s4706_s30   ;;  %s3795_s29 = sphi %s3878_s29, %s4705_s29   ;;  %s3791_s28 = sphi %s3876_s28, %s4704_s28   ;;  %s3787_s27 = sphi %s3874_s27, %s4703_s27   ;;  %s3783_s26 = sphi %s3872_s26, %s4702_s26   ;;  %s3779_s25 = sphi %s3870_s25, %s4701_s25   ;;  %s3775_s24 = sphi %s3868_s24, %s4700_s24  }
  0x13   : > { %4662 = sst [smem:[#allocation17_spill]] %s3803_s8  ;;  %s2610_s13 = sadd.s32 4294967294, %s3815_s11  }
  0x14   : > { %p57_p0 = scmp.ne.s32.totalorder %s3791_s28, %s3787_s27  ;;  %p3924_p1 = scmp.eq.s32.totalorder %s2609_s12, 0 }
  0x15   : > { %p208_p2 = scmp.ne.s32.totalorder %s3783_s26, %s3779_s25  ;;  %p209_p4 = scmp.eq.s32.totalorder %s2609_s12, 3 }
  0x16   : > { %s4663_s14 = scalar_select %p3924_p1, 1, 0 }
  0x17   : > { %p3933_p3 = por %p3924_p1, %p57_p0  ;;  %p214_p5 = scmp.ne.s32.totalorder %s3779_s25, %s3775_s24 }
  0x18   : > { %p215_p6 = scmp.eq.s32.totalorder %s2610_s13, 3  ;;  %p3939_p7 = por %p209_p4, %p208_p2 }
  0x19   : > { %s4664_s16 = scalar_select %p3933_p3, 1, 0 }
  0x1a   : > { %s4665_s17 = scalar_select %p3939_p7, 1, 0 }
  0x1b   : > { %p2611_p8 = scmp.ge.s32.totalorder %s3815_s11, 1  ;;  %p3944_p9 = por %p215_p6, %p214_p5 }
  0x1c   : > { %4666 = sst [smem:[#allocation18_spill]] %s4665_s17  ;;  %p222_p10 = scmp.lt.s32.totalorder %s3815_s11, 5 }
  0x1d   : > { %s4667_s18 = scalar_select %p3944_p9, 1, 0 }
  0x1e   : > { %p3949_p11 = pnand %p2611_p8, %p222_p10  ;;  %s3817_s20 = smov [#allocation6]  }
  0x1f   : > { %4668 = sst [smem:[#allocation19_spill]] %s4667_s18  ;;  %s234_s21 = sshll.u32 %s3817_s20, 4  ;;  %s3953_s21 = int_to_ptr.vmem [resolvable:$true] %s234_s21 }
  0x20   : > { %s4669_s19 = scalar_select %p3949_p11, 1, 0 }
  0x21   : > { %p3350_p12 = pneg %p3949_p11  ;;  %s3818_s23 = smov [#allocation8]  }
  0x22   : > { %s250_s27 = sshll.u32 %s3818_s23, 4  ;;  %s3819_s12 = smov [#allocation9]   ;;  %s3963_s27 = int_to_ptr.vmem [resolvable:$true] %s250_s27 }
  0x23   : > { %p3959_p13 = pnand %p3350_p12, %p3924_p1  ;;  %s3965_s13 = sshll.u32 %s3819_s12, 4  ;;  %s267_s13 = int_to_ptr.vmem [resolvable:$true] %s3965_s13 }
  0x24   : > { %s4671_s1 = sld [smem:[#allocation20_spill]] }
  0x25   : > { %p3975_p2 = pneg %p3959_p13 }
  0x2a   : > { %s3571_s20 = scalar_lea.hbm %s4671_s1, 1024 }
  0x2b   : > { %p3572_p0 = scmp.ne.s32.totalorder %s4671_s1, %s3571_s20  ;;  %p3578_p6 = scmp.lt.u32.totalorder %s3571_s20, %s4671_s1 }
  0x2d   : > { %p3574_p4 = pnand %p3975_p2, %p3572_p0 }
  0x2f   : > { %p3575_p5 = pneg %p3574_p4 }
  0x31   : > { %p3580_p8 = pnand %p3578_p6, %p3575_p5 }
  0x33   : > { %3583 = shalt.err (!%p3580_p8)
}
  0x34   : > { %s3584_s7 = scalar_lea.vmem %s3953_s21, 1024  ;;  %p3592_p7 = scmp.lt.s32.totalorder %s3953_s21, %s3953_s21 }
  0x35   : > { %p3585_p10 = scmp.ne.s32.totalorder %s3953_s21, %s3584_s7  ;;  %p3593_p1 = scmp.lt.s32.totalorder %s3584_s7, %s3584_s7 }
  0x37   : > { %p3587_p12 = pnand %p3585_p10, %p3975_p2  ;;  %p3594_p0 = por %p3593_p1, %p3592_p7 }
  0x39   : > { %p3588_p9 = pneg %p3587_p12 }
  0x3b   : > { %p3595_p4 = pnand %p3594_p0, %p3588_p9 }
  0x3d   : > { %3598 = shalt.err (!%p3595_p4)
}
  0x3e   : > { %s4653_s24 = smov 64   ;;  %s4654_s15 = smov 4  }
  0x3f   : > { %3353 = dma.hbm_to_vmem [thread:$0]  (!%p3959_p13), %s4671_s1, 1024, %s3953_s21, [#allocation7], %s4653_s24, %s4653_s24, %s4654_s15  }
  0x40   : > { %s4673_s3 = sld [smem:[#allocation22_spill]] }
  0x46   : > { %s3599_s7 = scalar_lea.hbm %s4673_s3, 9216 }
  0x47   : > { %p3600_p1 = scmp.ne.s32.totalorder %s4673_s3, %s3599_s7  ;;  %p3606_p5 = scmp.lt.u32.totalorder %s3599_s7, %s4673_s3 }
  0x49   : > { %p3602_p7 = pnand %p3600_p1, %p3975_p2 }
  0x4b   : > { %p3603_p9 = pneg %p3602_p7 }
  0x4d   : > { %p3608_p6 = pnand %p3606_p5, %p3603_p9 }
  0x4f   : > { %3611 = shalt.err (!%p3608_p6)
}
  0x50   : > { %s3612_s21 = scalar_lea.vmem %s3963_s27, 9216  ;;  %p3620_p0 = scmp.lt.s32.totalorder %s3963_s27, %s3963_s27 }
  0x51   : > { %p3613_p8 = scmp.ne.s32.totalorder %s3963_s27, %s3612_s21  ;;  %p3621_p4 = scmp.lt.s32.totalorder %s3612_s21, %s3612_s21 }
  0x53   : > { %p3615_p10 = pnand %p3613_p8, %p3975_p2  ;;  %p3622_p1 = por %p3621_p4, %p3620_p0 }
  0x55   : > { %p3616_p12 = pneg %p3615_p10 }
  0x57   : > { %p3623_p7 = pnand %p3622_p1, %p3616_p12 }
  0x59   : > { %3626 = shalt.err (!%p3623_p7)
}
  0x5a   : > { %3356 = dma.hbm_to_vmem [thread:$0]  (!%p3959_p13), %s4673_s3, 9216, %s3963_s27, [#allocation7], %s4653_s24, %s4653_s24, %s4654_s15  }
  0x5b   : > { %s3627_s18 = scalar_lea.hbm %s4640_s5, 1024 }
  0x5c   : > { %p3628_p9 = scmp.ne.s32.totalorder %s4640_s5, %s3627_s18  ;;  %p3634_p8 = scmp.lt.u32.totalorder %s3627_s18, %s4640_s5 }
  0x5e   : > { %p3630_p5 = pnand %p3628_p9, %p3975_p2 }
  0x60   : > { %p3631_p6 = pneg %p3630_p5 }
  0x62   : > { %p3636_p10 = pnand %p3634_p8, %p3631_p6 }
  0x64   : > { %3639 = shalt.err (!%p3636_p10)
}
  0x65   : > { %s3640_s21 = scalar_lea.vmem %s267_s13, 1024  ;;  %p3648_p1 = scmp.lt.s32.totalorder %s267_s13, %s267_s13 }
  0x66   : > { %p3641_p12 = scmp.ne.s32.totalorder %s267_s13, %s3640_s21  ;;  %p3649_p7 = scmp.lt.s32.totalorder %s3640_s21, %s3640_s21 }
  0x68   : > { %p3643_p0 = pnand %p3641_p12, %p3975_p2  ;;  %p3650_p3 = por %p3649_p7, %p3648_p1 }
  0x6a   : > { %p3644_p4 = pneg %p3643_p0 }
  0x6c   : > { %p3651_p11 = pnand %p3650_p3, %p3644_p4 }
  0x6e   : > { %3654 = shalt.err (!%p3651_p11)
}
  0x6f   : > { %3359 = dma.hbm_to_vmem [thread:$0]  (!%p3959_p13), %s4640_s5, 1024, %s267_s13, [#allocation10], %s4653_s24, %s4653_s24, %s4654_s15  }
  0x70   : > { %s34_s17 = sadd.s32 1, %s3807_s9  ;;  %s37_s22 = sadd.s32 1, %s3811_s10 }
  0x71   : > { %p35_p3 = scmp.ge.s32.totalorder %s34_s17, 2  ;;  %s44_s4 = sadd.s32 1, %s3795_s29 }
  0x72   : > { %p51_p11 = scmp.ne.s32.totalorder %s3795_s29, %s3791_s28  ;;  %p52_p2 = scmp.eq.s32.totalorder %s3815_s11, 0 }
  0x73   : > { %s4711_s17 = smov (%p35_p3, %s34_s17), 0  ;;  %s4713_s22 = smov (!%p35_p3, %s37_s22), %s3811_s10 }
  0x74   : > { %s194_s6 = ssub.s32 %s3807_s9, %s4711_s17  ;;  %p39_p9 = scmp.ge.s32.totalorder %s4713_s22, 2 }
  0x75   : > { %p3371_p5 = scmp.lt.s32.totalorder %s3815_s11, 4  ;;  %p4059_p13 = por %p52_p2, %p51_p11 }
  0x76   : > { %s283_s8 = sand.u32 1, %s3795_s29   ;;  %s4715_s22 = smov (%p39_p9, %s4713_s22), 0 }
  0x77   : > { %s3331_s18 = smul.u32 144, %s283_s8  ;;  %s41_s20 = ssub.s32 %s3811_s10, %s4715_s22 }
  0x78   : > { %s3332_s23 = smul.u32 2304, %s3811_s10  ;;  %p42_p6 = scmp.eq.s32.totalorder %s41_s20, 0 }
  0x79   : > { %s195_s12 = sor.u32 %s194_s6, %s41_s20  ;;  %s4675_s21 = sadd.s32 1, %s3783_s26 }
  0x7a   : > { %p196_p8 = scmp.eq.s32.totalorder %s195_s12, 0  ;;  %s4080_s15 = scalar_lea.hbm %s4635_s0, %s3332_s23 }
  0x7b   : > { %s4070_s7 = scalar_select %p42_p6, %s3795_s29, %s44_s4  }
  0x7c   : > { %s4075_s27 = scalar_select %p196_p8, %s3783_s26, %s4675_s21  }
  0x7d   : > { %s287_s1 = scalar_lea.vmem [#allocation3], %s3331_s18  ;;  %p4088_p10 = pnand %p3371_p5, %p4059_p13 }
  0x7e   : > { %s294_s3 = sshll.u32 %s287_s1, 4  ;;  %s4092_s6 = scalar_lea.sflag [#allocation4], %s283_s8  ;;  %s4082_s3 = int_to_ptr.vmem [resolvable:$true] %s294_s3 }
  0x7f   : > { %s3655_s24 = scalar_lea.hbm %s4080_s15, 2304  ;;  %p3657_p0 = pneg %p4088_p10 }
  0x80   : > { %p3656_p12 = scmp.ne.s32.totalorder %s4080_s15, %s3655_s24  ;;  %s3660_s13 = scalar_lea.hbm %s4635_s0, 4608 }
  0x81   : > { %p3661_p7 = scmp.lt.u32.totalorder %s4080_s15, %s4635_s0  ;;  %p3662_p3 = scmp.lt.u32.totalorder %s3660_s13, %s3655_s24 }
  0x82   : > { %p3658_p4 = pnand %p3657_p0, %p3656_p12  ;;  %p3664_p2 = scmp.lt.u32.totalorder %s3655_s24, %s4080_s15 }
  0x83   : > { %p3663_p11 = por %p3662_p3, %p3661_p7 }
  0x84   : > { %p3659_p1 = pneg %p3658_p4 }
  0x85   : > { %p3665_p9 = por %p3664_p2, %p3663_p11 }
  0x87   : > { %p3666_p5 = pnand %p3665_p9, %p3659_p1 }
  0x89   : > { %3669 = shalt.err (!%p3666_p5)
}
  0x8a   : > { %s3670_s8 = scalar_lea.vmem %s4082_s3, 2304  ;;  %s3822_s12 = smov [#allocation3]  }
  0x8b   : > { %p3671_p13 = scmp.ne.s32.totalorder %s4082_s3, %s3670_s8  ;;  %s3675_s21 = sshll.u32 %s3822_s12, 4  ;;  %s3676_s21 = int_to_ptr.vmem [resolvable:$false] %s3675_s21 }
  0x8c   : > { %s3677_s2 = scalar_lea.vmem %s3676_s21, 4608  ;;  %p3678_p12 = scmp.lt.s32.totalorder %s4082_s3, %s3676_s21 }
  0x8d   : > { %p3673_p6 = pnand %p3671_p13, %p3657_p0  ;;  %p3679_p4 = scmp.lt.s32.totalorder %s3677_s2, %s3670_s8 }
  0x8f   : > { %p3674_p8 = pneg %p3673_p6  ;;  %p3680_p7 = por %p3679_p4, %p3678_p12 }
  0x91   : > { %p3681_p3 = pnand %p3680_p7, %p3674_p8 }
  0x93   : > { %3684 = shalt.err (!%p3681_p3)
}
  0x94   : > { %s4677_s24 = smov 4   ;;  %s4678_s1 = smov 64  }
  0x95   : > { %3363 = dma.hbm_to_vmem [thread:$0]  (!%p4088_p10), %s4080_s15, 2304, %s4082_s3, %s4092_s6, %s4678_s1, %s4678_s1, %s4677_s24  }
  0x96   : > { %p4679_p0 = scmp.ne.s32.totalorder %s4669_s19, 0 }
  0x97   : > { %s308_s18 = sand.u32 (!%p4679_p0), 1, %s3791_s28   ;;  %p4680_p1 = scmp.ne.s32.totalorder (!%p4679_p0), %s4664_s16, 0 }
  0x98   : > { %306 = sbr.rel (%p4679_p0) target bundleno = 1122 (0x462), region = 48  ;;  %s309_s20 = scalar_lea.sflag (!%p4679_p0), [#allocation4], %s308_s18 }
  0x99   : > { %s3333_s13 = smul.u32 (!%p4679_p0), 144, %s308_s18 }
  0x9b   : > { %s312_s23 = scalar_lea.vmem (!%p4679_p0), [#allocation3], %s3333_s13 }
  0x9f   : > { %3758 = dma.done.wait (%p4680_p1), %s309_s20, 2304  }
  0xa0   : > { %3760 = vsyncadd (%p4680_p1), %s309_s20, 4294964992  ;;  %p4681_p11 = scmp.ne.s32.totalorder %s4663_s14, 0 }
  0xa2   : > { %3762 = dma.done.wait (%p4681_p11), [#allocation7], 10240  }
  0xa3   : > { %3764 = vsyncadd (%p4681_p11), [#allocation7], 4294957056 }
  0xa4   : > { %3766 = dma.done.wait (%p4681_p11), [#allocation10], 1024  }
  0xa5   : > { %3768 = vsyncadd (%p4681_p11), [#allocation10], 4294966272  ;;  %s352_s3 = sand.u32 1, %s3779_s25   ;;  %v3473_v0 = vld [vmem:[#allocation6] sm:$0xff]   ;;  %v3474_v1 = vld [vmem:[#allocation6 + $0x8] sm:$0xff]   ;;  %s2754_s16 = sshll.u32 %s3799_s30, 6 }
  0xa6   : > { %s4141_s19 = sshll.u32 %s352_s3, 7  ;;  %3071 = vmatprep.subr.bf16.mxu0 %v3473_v0  ;;  %3235 = vmatprep.subr.bf16.mxu1 %v3473_v0  ;;  %v3475_v2 = vld [vmem:[#allocation6 + $0x10] sm:$0xff]   ;;  %s4144_s15 = scalar_lea.vmem %s312_s23, %s2754_s16 [#allocation3]  ;;  %v3476_v3 = vld [vmem:[#allocation6 + $0x18] sm:$0xff]   ;;  %v3477_v5 = vld [vmem:[#allocation6 + $0x20] sm:$0xff]   ;;  %vm745_vm0 = vcmask 1047552   ;;  %vm778_vm3 = vcmask 1040384  }
  0xa7   : > { %3072 = vmatpush3.bf16.msra.mxu0 %v3473_v0  ;;  %3243 = vmatpush3.bf16.msra.mxu1 %v3473_v0  ;;  %v3481_v4 = vld [vmem:[%s4144_s15] sm:$0xff]   ;;  %v3478_v7 = vld [vmem:[#allocation6 + $0x28] sm:$0xff]   ;;  %v3480_v9 = vld [vmem:[#allocation6 + $0x38] sm:$0xff]   ;;  %s4682_s6 = sld [smem:[#allocation21_spill]]  ;;  %vm746_vm1 = vsmask.f32 7938 }
  0xa8   : > { %3073 = vmatprep.subr.bf16.mxu0 %v3474_v1  ;;  %3236 = vmatprep.subr.bf16.mxu1 %v3474_v1  ;;  %v3487_v6 = vld [vmem:[%s4144_s15 + $0x40] sm:$0xff]   ;;  %v3482_v10 = vld [vmem:[%s4144_s15 + $0x8] sm:$0xff]   ;;  %v3483_v12 = vld [vmem:[%s4144_s15 + $0x10] sm:$0xff]   ;;  %vm841_vm2 = vsmask.f32 7424  ;;  %vm873_vm5 = vcmask 1047559  }
  0xa9   : > { %3087 = vmatprep.mubr.bf16.mxu0 %v3481_v4  ;;  %3103 = vmatprep.mubr.bf16.mxu1 %v3487_v6  ;;  %v3479_v8 = vld [vmem:[#allocation6 + $0x30] sm:$0xff]   ;;  %v3488_v11 = vld [vmem:[%s4144_s15 + $0x48] sm:$0xff]   ;;  %v3484_v13 = vld [vmem:[%s4144_s15 + $0x18] sm:$0xff]   ;;  %vm779_vm4 = vsmask.f32 256  ;;  %s4291_s8 = scalar_lea.vmem [#allocation11], %s4141_s19 }
  0xaa   : > { %v3485_v14 = vld [vmem:[%s4144_s15 + $0x20] sm:$0xff]   ;;  %v3486_v15 = vld [vmem:[%s4144_s15 + $0x28] sm:$0xff]   ;;  %v3489_v16 = vld [vmem:[%s4144_s15 + $0x30] sm:$0xff]   ;;  %vm874_vm6 = vsmask.f32 7966  ;;  %p2644_p10 = scmp.ne.s32.totalorder %s3799_s30, 0 }
  0xab   : > { %3074 = vmatpush3.bf16.msra.mxu0 %v3474_v1  ;;  %3244 = vmatpush3.bf16.msra.mxu1 %v3474_v1  ;;  %v3490_v17 = vld [vmem:[%s4144_s15 + $0x38] sm:$0xff]   ;;  %vm4176_vm7 = vmand %vm745_vm0, %vm746_vm1 }
  0xac   : > { %3075 = vmatprep.subr.bf16.mxu0 %v3475_v2  ;;  %3237 = vmatprep.subr.bf16.mxu1 %v3475_v2  ;;  %v751_v0 = vld [vmem:[#allocation2 + $0x18] sm:$0xff]  ;;  %vm4183_vm8 = vmand %vm745_vm0, %vm841_vm2 }
  0xad   : > { %v4159_v18 = vld [vmem:[%s4682_s6] ss:$0 sm:$0xff]  ;;  %vm4205_vm9 = vmand %vm778_vm3, %vm779_vm4 }
  0xae   : > { %vm4212_vm10 = vmand %vm873_vm5, %vm874_vm6 }
  0xaf   : > { %3076 = vmatpush3.bf16.msra.mxu0 %v3475_v2  ;;  %3245 = vmatpush3.bf16.msra.mxu1 %v3475_v2  ;;  %v846_v2 = vld [vmem:[#allocation2 + $0x28] sm:$0xff] }
  0xb0   : > { %3077 = vmatprep.subr.bf16.mxu0 %v3476_v3  ;;  %3238 = vmatprep.subr.bf16.mxu1 %v3476_v3 }
  0xb3   : > { %3078 = vmatpush3.bf16.msra.mxu0 %v3476_v3  ;;  %3246 = vmatpush3.bf16.msra.mxu1 %v3476_v3 }
  0xb4   : > { %3079 = vmatprep.subr.bf16.mxu0 %v3477_v5  ;;  %3239 = vmatprep.subr.bf16.mxu1 %v3477_v5 }
  0xb7   : > { %3080 = vmatpush3.bf16.msra.mxu0 %v3477_v5  ;;  %3247 = vmatpush3.bf16.msra.mxu1 %v3477_v5 }
  0xb8   : > { %3081 = vmatprep.subr.bf16.mxu0 %v3478_v7  ;;  %3240 = vmatprep.subr.bf16.mxu1 %v3478_v7 }
  0xbb   : > { %3082 = vmatpush3.bf16.msra.mxu0 %v3478_v7  ;;  %3248 = vmatpush3.bf16.msra.mxu1 %v3478_v7 }
  0xbc   : > { %3083 = vmatprep.subr.bf16.mxu0 %v3479_v8  ;;  %3241 = vmatprep.subr.bf16.mxu1 %v3479_v8 }
  0xbf   : > { %3084 = vmatpush3.bf16.msra.mxu0 %v3479_v8  ;;  %3249 = vmatpush3.bf16.msra.mxu1 %v3479_v8 }
  0xc0   : > { %3085 = vmatprep.subr.bf16.mxu0 %v3480_v9  ;;  %3242 = vmatprep.subr.bf16.mxu1 %v3480_v9 }
  0xc3   : > { %3086 = vmatpush3.bf16.msra.mxu0 %v3480_v9  ;;  %3250 = vmatpush3.bf16.msra.mxu1 %v3480_v9  ;;  %v748_v9 = vld [vmem:[#allocation2] sm:$0xff] }
  0xc6   : > { %3088 = vmatmul.mubr.bf16.vlgmr.msra.gmra.mrb[0].mxu0 %v3482_v10  ;;  %3104 = vmatmul.mubr.bf16.vlgmr.msra.gmra.mrb[0].mxu1 %v3488_v11  ;;  %v843_v10 = vld [vmem:[#allocation2 + $0x10] sm:$0xff] }
  0xc7   : > { %3091 = vmatprep.mubr.bf16.mxu0 %v3483_v12 }
  0xce   : > { %3092 = vmatmul.mubr.bf16.gmra.mrb[4].mxu0 %v3484_v13 }
  0xcf   : > { %3095 = vmatprep.mubr.bf16.mxu0 %v3485_v14 }
  0xd6   : > { %3096 = vmatmul.mubr.bf16.gmra.mrb[8].mxu0 %v3486_v15 }
  0xd7   : > { %3099 = vmatprep.mubr.bf16.mxu0 %v3489_v16  ;;  %v775_v16 = vld [vmem:[#allocation2 + $0xd8] sm:$0xff] }
  0xde   : > { %3100 = vmatmul.mubr.bf16.gmra.mrb[12].mxu0 %v3490_v17 }
 0x199   : > { %v3089_v19 = vpop.f32.mrb[0].mxu0  ;;  %v3105_v20 = vpop.f32.mrb[0].mxu1 }
 0x19a   : > { %v555_v21 = vadd.f32 %v3089_v19, %v4159_v18  ;;  %v546_v22 = vpop.f32.mrb[1].mxu0  ;;  %v619_v23 = vadd.f32 %v3105_v20, %v4159_v18  ;;  %v610_v24 = vpop.f32.mrb[1].mxu1 }
 0x19b   : > { %v547_v25 = vadd.f32 %v4159_v18, %v546_v22  ;;  %v3090_v26 = vpop.f32.mrb[2].mxu0  ;;  %v611_v27 = vadd.f32 %v4159_v18, %v610_v24  ;;  %v3106_v28 = vpop.f32.mrb[2].mxu1 }
 0x19c   : > { %v558_v29 = vadd.f32 %v3090_v26, %v4159_v18  ;;  %v549_v30 = vpop.f32.mrb[3].mxu0  ;;  %v643_v31 = vmax.f32 %v619_v23, 0.0  ;;  %v622_v32 = vadd.f32 %v3106_v28, %v4159_v18  ;;  %v613_v33 = vpop.f32.mrb[3].mxu1  ;;  %v627_v37 = vmax.f32 %v555_v21, 0.0  ;;  %v870_v23 = vld [vmem:[#allocation2 + $0xe8] sm:$0xff] }
 0x19d   : > { %v550_v34 = vadd.f32 %v4159_v18, %v549_v30  ;;  %v641_v35 = vmax.f32 %v611_v27, 0.0  ;;  %v614_v36 = vadd.f32 %v4159_v18, %v613_v33  ;;  %v625_v40 = vmax.f32 %v547_v25, 0.0 }
 0x19e   : > { %v628_v38 = vmax.f32 %v558_v29, 0.0  ;;  %v644_v39 = vmax.f32 %v622_v32, 0.0 }
 0x19f   : > { %v626_v41 = vmax.f32 %v550_v34, 0.0  ;;  %v642_v42 = vmax.f32 %v614_v36, 0.0 }
 0x1a0   : > { %v646_v43 = vpack.c.bf16 %v628_v38, %v627_v37  ;;  %v654_v44 = vpack.c.bf16 %v644_v39, %v643_v31 }
 0x1a1   : > { %v645_v45 = vpack.c.bf16 %v626_v41, %v625_v40  ;;  %v3093_v46 = vpop.f32.mrb[4].mxu0  ;;  %v4169_v47 = vpack.c.bf16 %v642_v42, %v641_v35 }
 0x1a2   : > { %656 = vst [vmem:[#allocation2 + $0x20] sm:$0xff] %v646_v43  ;;  %v673_v48 = vshrl.u32 %v646_v43, 16  ;;  %v676_v49 = vshll.u32 %v646_v43, 16  ;;  %v571_v50 = vadd.f32 %v3093_v46, %v4159_v18  ;;  %v562_v51 = vpop.f32.mrb[5].mxu0  ;;  %664 = vst [vmem:[#allocation2 + $0xe0] sm:$0xff] %v654_v44  ;;  %v729_v52 = vshrl.u32 %v654_v44, 16 }
 0x1a3   : > { %655 = vst [vmem:[#allocation2 + $0x8] sm:$0xff] %v645_v45  ;;  %v666_v53 = vshrl.u32 %v645_v45, 16  ;;  %v669_v54 = vshll.u32 %v645_v45, 16  ;;  %v563_v55 = vadd.f32 %v4159_v18, %v562_v51  ;;  %v3094_v56 = vpop.f32.mrb[6].mxu0  ;;  %v732_v57 = vshll.u32 %v654_v44, 16  ;;  %663 = vst [vmem:[#allocation2 + $0xc8] sm:$0xff] %v4169_v47 }
 0x1a4   : > { %v675_v58 = vrot.slane %v673_v48, 7  ;;  %v813_v60 = vrot.slane %v676_v49, 1  ;;  %v631_v61 = vmax.f32 %v571_v50, 0.0  ;;  %v574_v62 = vadd.f32 %v3094_v56, %v4159_v18  ;;  %v565_v63 = vpop.f32.mrb[7].mxu0  ;;  %v757_v45 = vld [vmem:[#allocation2 + $0x48] sm:$0xff]  ;;  %v852_v46 = vld [vmem:[#allocation2 + $0x58] sm:$0xff] }
 0x1a5   : > { %v668_v3 = vrot.slane %v666_v53, 7  ;;  %v811_v4 = vrot.slane %v669_v54, 1  ;;  %v629_v5 = vmax.f32 %v563_v55, 0.0  ;;  %v566_v6 = vadd.f32 %v4159_v18, %v565_v63  ;;  %v754_v55 = vld [vmem:[#allocation2 + $0x30] sm:$0xff]  ;;  %v849_v56 = vld [vmem:[#allocation2 + $0x40] sm:$0xff] }
 0x1a6   : > { %v678_v7 = vor.u32 %v676_v49, %v675_v58  ;;  %v814_v8 = vor.u32 %v813_v60, %v673_v48  ;;  %v632_v11 = vmax.f32 %v574_v62, 0.0  ;;  %v731_v12 = vrot.slane %v729_v52, 7 }
 0x1a7   : > { %v671_v13 = vor.u32 %v669_v54, %v668_v3  ;;  %v812_v14 = vor.u32 %v811_v4, %v666_v53  ;;  %v630_v15 = vmax.f32 %v566_v6, 0.0  ;;  %v829_v17 = vrot.slane %v732_v57, 1 }
 0x1a8   : > { %v752_v19 = vsel %vm4176_vm7, %v678_v7, %v751_v0  ;;  %v847_v20 = vsel %vm4183_vm8, %v814_v8, %v846_v2  ;;  %v648_v21 = vpack.c.bf16 %v632_v11, %v631_v61  ;;  %v734_v22 = vor.u32 %v732_v57, %v731_v12  ;;  %v772_v7 = vld [vmem:[#allocation2 + $0xc0] sm:$0xff] }
 0x1a9   : > { %753 = vst [vmem:[#allocation2 + $0x18] sm:$0xff] %v752_v19  ;;  %848 = vst [vmem:[#allocation2 + $0x28] sm:$0xff] %v847_v20  ;;  %v749_v24 = vsel %vm4176_vm7, %v671_v13, %v748_v9  ;;  %v844_v25 = vsel %vm4183_vm8, %v812_v14, %v843_v10  ;;  %v647_v26 = vpack.c.bf16 %v630_v15, %v629_v5  ;;  %v3097_v27 = vpop.f32.mrb[8].mxu0  ;;  %v722_v58 = vshrl.u32 %v4169_v47, 16 }
 0x1aa   : > { %v830_v28 = vor.u32 %v829_v17, %v729_v52  ;;  %750 = vst [vmem:[#allocation2] sm:$0xff] %v749_v24  ;;  %845 = vst [vmem:[#allocation2 + $0x10] sm:$0xff] %v844_v25  ;;  %v687_v29 = vshrl.u32 %v648_v21, 16  ;;  %v690_v30 = vshll.u32 %v648_v21, 16  ;;  %v587_v31 = vadd.f32 %v3097_v27, %v4159_v18  ;;  %v578_v32 = vpop.f32.mrb[9].mxu0 }
 0x1ab   : > { %658 = vst [vmem:[#allocation2 + $0x50] sm:$0xff] %v648_v21  ;;  %v776_v33 = vsel %vm4176_vm7, %v734_v22, %v775_v16  ;;  %657 = vst [vmem:[#allocation2 + $0x38] sm:$0xff] %v647_v26  ;;  %v680_v34 = vshrl.u32 %v647_v26, 16  ;;  %v683_v35 = vshll.u32 %v647_v26, 16  ;;  %v579_v36 = vadd.f32 %v4159_v18, %v578_v32  ;;  %v3098_v37 = vpop.f32.mrb[10].mxu0  ;;  %v858_v32 = vld [vmem:[#allocation2 + $0x88] sm:$0xff] }
 0x1ac   : > { %777 = vst [vmem:[#allocation2 + $0xd8] sm:$0xff] %v776_v33  ;;  %v871_v38 = vsel %vm4183_vm8, %v830_v28, %v870_v23  ;;  %v689_v39 = vrot.slane %v687_v29, 7  ;;  %v817_v40 = vrot.slane %v690_v30, 1  ;;  %v635_v41 = vmax.f32 %v587_v31, 0.0  ;;  %v581_v43 = vpop.f32.mrb[11].mxu0  ;;  %v867_v28 = vld [vmem:[#allocation2 + $0xd0] sm:$0xff] }
 0x1ad   : > { %v590_v42 = vadd.f32 %v3098_v37, %v4159_v18  ;;  %872 = vst [vmem:[#allocation2 + $0xe8] sm:$0xff] %v871_v38  ;;  %v682_v48 = vrot.slane %v680_v34, 7  ;;  %v815_v49 = vrot.slane %v683_v35, 1  ;;  %v633_v50 = vmax.f32 %v579_v36, 0.0  ;;  %v763_v31 = vld [vmem:[#allocation2 + $0x78] sm:$0xff] }
 0x1ae   : > { %v582_v51 = vadd.f32 %v4159_v18, %v581_v43  ;;  %v692_v53 = vor.u32 %v690_v30, %v689_v39  ;;  %v818_v54 = vor.u32 %v817_v40, %v687_v29  ;;  %v725_v63 = vshll.u32 %v4169_v47, 16 }
 0x1af   : > { %v636_v57 = vmax.f32 %v590_v42, 0.0  ;;  %v685_v60 = vor.u32 %v683_v35, %v682_v48  ;;  %v816_v61 = vor.u32 %v815_v49, %v680_v34  ;;  %v724_v6 = vrot.slane %v722_v58, 7 }
 0x1b0   : > { %v634_v62 = vmax.f32 %v582_v51, 0.0  ;;  %v784_v0 = vld [vmem:[#allocation2 + $0x18] sm:$0x1]  ;;  %v879_v2 = vld [vmem:[#allocation2 + $0x28] sm:$0x80]  ;;  %v758_v3 = vsel %vm4176_vm7, %v692_v53, %v757_v45  ;;  %v853_v4 = vsel %vm4183_vm8, %v818_v54, %v852_v46  ;;  %v827_v23 = vrot.slane %v725_v63, 1 }
 0x1b1   : > { %v650_v5 = vpack.c.bf16 %v636_v57, %v635_v41  ;;  %v785_v8 = vsel %vm4205_vm9, 0, %v784_v0  ;;  %v880_v9 = vsel %vm4212_vm10, 0, %v879_v2  ;;  %v781_v10 = vld [vmem:[#allocation2] sm:$0x1]  ;;  %v876_v11 = vld [vmem:[#allocation2 + $0x10] sm:$0x80]  ;;  %v755_v47 = vsel %vm4176_vm7, %v685_v60, %v754_v55 }
 0x1b2   : > { %759 = vst [vmem:[#allocation2 + $0x48] sm:$0xff] %v758_v3  ;;  %854 = vst [vmem:[#allocation2 + $0x58] sm:$0xff] %v853_v4  ;;  %v850_v12 = vsel %vm4183_vm8, %v816_v61, %v849_v56  ;;  %v782_v13 = vsel %vm4205_vm9, 0, %v781_v10  ;;  %v877_v14 = vsel %vm4212_vm10, 0, %v876_v11  ;;  %v649_v19 = vpack.c.bf16 %v634_v62, %v633_v50  ;;  %v3101_v24 = vpop.f32.mrb[12].mxu0  ;;  %v760_v45 = vld [vmem:[#allocation2 + $0x60] sm:$0xff] }
 0x1b3   : > { %786 = vst [vmem:[#allocation2 + $0x18] sm:$0x1] %v785_v8  ;;  %881 = vst [vmem:[#allocation2 + $0x28] sm:$0x80] %v880_v9  ;;  %v701_v15 = vshrl.u32 %v650_v5, 16  ;;  %v704_v16 = vshll.u32 %v650_v5, 16  ;;  %v727_v22 = vor.u32 %v725_v63, %v724_v6  ;;  %v603_v29 = vadd.f32 %v3101_v24, %v4159_v18 }
 0x1b4   : > { %756 = vst [vmem:[#allocation2 + $0x30] sm:$0xff] %v755_v47  ;;  %851 = vst [vmem:[#allocation2 + $0x40] sm:$0xff] %v850_v12  ;;  %v808_v17 = vld [vmem:[#allocation2 + $0xd8] sm:$0x1]  ;;  %v903_v21 = vld [vmem:[#allocation2 + $0xe8] sm:$0x80]  ;;  %v828_v36 = vor.u32 %v827_v23, %v722_v58 }
 0x1b5   : > { %660 = vst [vmem:[#allocation2 + $0x80] sm:$0xff] %v650_v5  ;;  %783 = vst [vmem:[#allocation2] sm:$0x1] %v782_v13  ;;  %v809_v20 = vsel %vm4205_vm9, 0, %v808_v17  ;;  %v703_v25 = vrot.slane %v701_v15, 7  ;;  %v821_v26 = vrot.slane %v704_v16, 1  ;;  %v773_v35 = vsel %vm4176_vm7, %v727_v22, %v772_v7 }
 0x1b6   : > { %878 = vst [vmem:[#allocation2 + $0x10] sm:$0x80] %v877_v14  ;;  %810 = vst [vmem:[#allocation2 + $0xd8] sm:$0x1] %v809_v20  ;;  %v904_v27 = vsel %vm4212_vm10, 0, %v903_v21  ;;  %v594_v30 = vpop.f32.mrb[13].mxu0  ;;  %v868_v48 = vsel %vm4183_vm8, %v828_v36, %v867_v28 }
 0x1b7   : > { %659 = vst [vmem:[#allocation2 + $0x68] sm:$0xff] %v649_v19  ;;  %v694_v33 = vshrl.u32 %v649_v19, 16  ;;  %v697_v34 = vshll.u32 %v649_v19, 16  ;;  %905 = vst [vmem:[#allocation2 + $0xe8] sm:$0x80] %v904_v27  ;;  %v3102_v37 = vpop.f32.mrb[14].mxu0  ;;  %v706_v38 = vor.u32 %v704_v16, %v703_v25  ;;  %v822_v39 = vor.u32 %v821_v26, %v701_v15 }
 0x1b8   : > { %774 = vst [vmem:[#allocation2 + $0xc0] sm:$0xff] %v773_v35  ;;  %v639_v40 = vmax.f32 %v603_v29, 0.0  ;;  %v595_v41 = vadd.f32 %v4159_v18, %v594_v30  ;;  %v597_v42 = vpop.f32.mrb[15].mxu0  ;;  %v606_v49 = vadd.f32 %v3102_v37, %v4159_v18  ;;  %v855_v55 = vld [vmem:[#allocation2 + $0x70] sm:$0xff]  ;;  %869 = vst [vmem:[#allocation2 + $0xd0] sm:$0xff] %v868_v48  ;;  %v769_v22 = vld [vmem:[#allocation2 + $0xa8] sm:$0xff] }
 0x1b9   : > { %v696_v43 = vrot.slane %v694_v33, 7  ;;  %v819_v46 = vrot.slane %v697_v34, 1  ;;  %v790_v50 = vld [vmem:[#allocation2 + $0x48] sm:$0x1]  ;;  %v885_v51 = vld [vmem:[#allocation2 + $0x58] sm:$0x80]  ;;  %v764_v53 = vsel %vm4176_vm7, %v706_v38, %v763_v31  ;;  %v859_v54 = vsel %vm4183_vm8, %v822_v39, %v858_v32 }
 0x1ba   : > { %v637_v56 = vmax.f32 %v595_v41, 0.0  ;;  %v598_v57 = vadd.f32 %v4159_v18, %v597_v42  ;;  %v791_v58 = vsel %vm4205_vm9, 0, %v790_v50  ;;  %v886_v60 = vsel %vm4212_vm10, 0, %v885_v51  ;;  %765 = vst [vmem:[#allocation2 + $0x78] sm:$0xff] %v764_v53  ;;  %860 = vst [vmem:[#allocation2 + $0x88] sm:$0xff] %v859_v54  ;;  %v864_v26 = vld [vmem:[#allocation2 + $0xb8] sm:$0xff] }
 0x1bb   : > { %v787_v61 = vld [vmem:[#allocation2 + $0x30] sm:$0x1]  ;;  %v882_v62 = vld [vmem:[#allocation2 + $0x40] sm:$0x80]  ;;  %v699_v63 = vor.u32 %v697_v34, %v696_v43  ;;  %v820_v0 = vor.u32 %v819_v46, %v694_v33  ;;  %792 = vst [vmem:[#allocation2 + $0x48] sm:$0x1] %v791_v58 }
 0x1bc   : > { %887 = vst [vmem:[#allocation2 + $0x58] sm:$0x80] %v886_v60  ;;  %v788_v2 = vsel %vm4205_vm9, 0, %v787_v61  ;;  %v883_v18 = vsel %vm4212_vm10, 0, %v882_v62  ;;  %v640_v3 = vmax.f32 %v606_v49, 0.0  ;;  %v638_v4 = vmax.f32 %v598_v57, 0.0 }
 0x1bd   : > { %789 = vst [vmem:[#allocation2 + $0x30] sm:$0x1] %v788_v2  ;;  %884 = vst [vmem:[#allocation2 + $0x40] sm:$0x80] %v883_v18  ;;  %v761_v5 = vsel %vm4176_vm7, %v699_v63, %v760_v45  ;;  %v856_v6 = vsel %vm4183_vm8, %v820_v0, %v855_v55  ;;  %v766_v27 = vld [vmem:[#allocation2 + $0x90] sm:$0xff]  ;;  %v861_v33 = vld [vmem:[#allocation2 + $0xa0] sm:$0xff] }
 0x1be   : > { %762 = vst [vmem:[#allocation2 + $0x60] sm:$0xff] %v761_v5  ;;  %857 = vst [vmem:[#allocation2 + $0x70] sm:$0xff] %v856_v6  ;;  %v652_v7 = vpack.c.bf16 %v640_v3, %v639_v40  ;;  %v651_v8 = vpack.c.bf16 %v638_v4, %v637_v56  ;;  %v3823_v49 = vmov (!%p2644_p10), 0  }
 0x1bf   : > { %v805_v9 = vld [vmem:[#allocation2 + $0xc0] sm:$0x1]  ;;  %v900_v13 = vld [vmem:[#allocation2 + $0xd0] sm:$0x80]  ;;  %910 = vst [vmem:[#allocation2] sm:$0xff] (!%p2644_p10), %v3823_v49  ;;  %911 = vst [vmem:[#allocation2 + $0x8] sm:$0xff] (!%p2644_p10), %v3823_v49 }
 0x1c0   : > { %v806_v10 = vsel %vm4205_vm9, 0, %v805_v9  ;;  %662 = vst [vmem:[#allocation2 + $0xb0] sm:$0xff] %v652_v7  ;;  %v715_v11 = vshrl.u32 %v652_v7, 16  ;;  %v718_v47 = vshll.u32 %v652_v7, 16  ;;  %661 = vst [vmem:[#allocation2 + $0x98] sm:$0xff] %v651_v8  ;;  %v708_v12 = vshrl.u32 %v651_v8, 16 }
 0x1c1   : > { %807 = vst [vmem:[#allocation2 + $0xc0] sm:$0x1] %v806_v10  ;;  %v711_v14 = vshll.u32 %v651_v8, 16  ;;  %v796_v15 = vld [vmem:[#allocation2 + $0x78] sm:$0x1]  ;;  %v901_v17 = vsel %vm4212_vm10, 0, %v900_v13 }
 0x1c2   : > { %v891_v16 = vld [vmem:[#allocation2 + $0x88] sm:$0x80]  ;;  %v717_v19 = vrot.slane %v715_v11, 7  ;;  %v797_v20 = vsel %vm4205_vm9, 0, %v796_v15  ;;  %902 = vst [vmem:[#allocation2 + $0xd0] sm:$0x80] %v901_v17 }
 0x1c3   : > { %v892_v21 = vsel %vm4212_vm10, 0, %v891_v16  ;;  %v825_v23 = vrot.slane %v718_v47, 1  ;;  %v710_v24 = vrot.slane %v708_v12, 7  ;;  %798 = vst [vmem:[#allocation2 + $0x78] sm:$0x1] %v797_v20  ;;  %v823_v28 = vrot.slane %v711_v14, 1 }
 0x1c4   : > { %893 = vst [vmem:[#allocation2 + $0x88] sm:$0x80] %v892_v21  ;;  %v720_v25 = vor.u32 %v718_v47, %v717_v19  ;;  %912 = vst [vmem:[#allocation2 + $0x10] sm:$0xff] (!%p2644_p10), %v3823_v49 }
 0x1c5   : > { %v793_v29 = vld [vmem:[#allocation2 + $0x60] sm:$0x1]  ;;  %v888_v30 = vld [vmem:[#allocation2 + $0x70] sm:$0x80]  ;;  %v826_v31 = vor.u32 %v825_v23, %v715_v11  ;;  %v713_v32 = vor.u32 %v711_v14, %v710_v24  ;;  %v824_v37 = vor.u32 %v823_v28, %v708_v12 }
 0x1c6   : > { %v794_v34 = vsel %vm4205_vm9, 0, %v793_v29  ;;  %v889_v35 = vsel %vm4212_vm10, 0, %v888_v30  ;;  %v770_v36 = vsel %vm4176_vm7, %v720_v25, %v769_v22 }
 0x1c7   : > { %795 = vst [vmem:[#allocation2 + $0x60] sm:$0x1] %v794_v34  ;;  %890 = vst [vmem:[#allocation2 + $0x70] sm:$0x80] %v889_v35  ;;  %v865_v38 = vsel %vm4183_vm8, %v826_v31, %v864_v26  ;;  %v767_v39 = vsel %vm4176_vm7, %v713_v32, %v766_v27  ;;  %v862_v40 = vsel %vm4183_vm8, %v824_v37, %v861_v33 }
 0x1c8   : > { %771 = vst [vmem:[#allocation2 + $0xa8] sm:$0xff] %v770_v36  ;;  %866 = vst [vmem:[#allocation2 + $0xb8] sm:$0xff] %v865_v38 }
 0x1c9   : > { %768 = vst [vmem:[#allocation2 + $0x90] sm:$0xff] %v767_v39  ;;  %863 = vst [vmem:[#allocation2 + $0xa0] sm:$0xff] %v862_v40 }
 0x1cc   : > { %909 = sbr.rel (%p2644_p10) target bundleno = 467 (0x1d3), region = 68 }
 0x1cf   : > { %v802_v41 = vld [vmem:[#allocation2 + $0xa8] sm:$0x1]  ;;  %v897_v43 = vld [vmem:[#allocation2 + $0xb8] sm:$0x80] }
 0x1d0   : > { %v803_v42 = vsel %vm4205_vm9, 0, %v802_v41  ;;  %v799_v45 = vld [vmem:[#allocation2 + $0x90] sm:$0x1]  ;;  %v898_v46 = vsel %vm4212_vm10, 0, %v897_v43  ;;  %v894_v48 = vld [vmem:[#allocation2 + $0xa0] sm:$0x80] }
 0x1d1   : > { %804 = vst [vmem:[#allocation2 + $0xa8] sm:$0x1] %v803_v42  ;;  %v800_v59 = vsel %vm4205_vm9, 0, %v799_v45  ;;  %899 = vst [vmem:[#allocation2 + $0xb8] sm:$0x80] %v898_v46  ;;  %v895_v1 = vsel %vm4212_vm10, 0, %v894_v48 }
 0x1d2   : > { %801 = vst [vmem:[#allocation2 + $0x90] sm:$0x1] %v800_v59  ;;  %896 = vst [vmem:[#allocation2 + $0xa0] sm:$0x80] %v895_v1 }
 0x1d3 PF: > { %p2645_p2 = scmp.ne.s32.totalorder %s3799_s30, 1 }
 0x1d4   : > { %v3824_v44 = vmov (!%p2645_p2), 0  }
 0x1d5   : > { %916 = sbr.rel (%p2645_p2) target bundleno = 476 (0x1dc), region = 72  ;;  %918 = vst [vmem:[#allocation2 + $0xd8] sm:$0xff] (!%p2645_p2), %v3824_v44  ;;  %919 = vst [vmem:[#allocation2 + $0xe0] sm:$0xff] (!%p2645_p2), %v3824_v44 }
 0x1d6   : > { %920 = vst [vmem:[#allocation2 + $0xe8] sm:$0xff] (!%p2645_p2), %v3824_v44 }
 0x1dc PF: > { %v3491_v52 = vld [vmem:[#allocation8 + $0x100] sm:$0xff]   ;;  %v3494_v53 = vld [vmem:[#allocation8 + $0x108] sm:$0xff]   ;;  %v3497_v56 = vld [vmem:[#allocation8 + $0x110] sm:$0xff]   ;;  %s4691_s2 = sld [smem:[#allocation23_spill]]  ;;  %s4692_s18 = sld [smem:[#allocation24_spill]] }
 0x1dd   : > { %v3492_v50 = vld [vmem:[#allocation8 + $0x140] sm:$0xff]   ;;  %2815 = vmatprep.subr.bf16.mxu1 %v3491_v52  ;;  %v3495_v54 = vld [vmem:[#allocation8 + $0x148] sm:$0xff]   ;;  %v3498_v57 = vld [vmem:[#allocation8 + $0x150] sm:$0xff]   ;;  %s4693_s13 = sld [smem:[#allocation17_spill]]  ;;  %s2756_s20 = sshll.u32 %s3799_s30, 4 }
 0x1de   : > { %v3493_v51 = vld [vmem:[#allocation8 + $0xc0] sm:$0xff]   ;;  %3107 = vmatprep.subr.bf16.mxu0 %v3492_v50  ;;  %v3496_v55 = vld [vmem:[#allocation8 + $0xc8] sm:$0xff]   ;;  %v3499_v58 = vld [vmem:[#allocation8 + $0xd0] sm:$0xff]   ;;  %s2487_s16 = sshll.u32 %s4291_s8, 4  ;;  %s4695_s6 = sld [smem:[#allocation25_spill]]  ;;  %s4567_s16 = int_to_ptr.vmem [resolvable:$true] %s2487_s16 }
 0x1df   : > { %2816 = vmatpush3.bf16.msra.mxu1 %v3493_v51  ;;  %3108 = vmatpush3.bf16.msra.mxu0 %v3492_v50  ;;  %v3500_v60 = vld [vmem:[#allocation8 + $0x118] sm:$0xff]   ;;  %v3503_v63 = vld [vmem:[#allocation8 + $0x120] sm:$0xff]   ;;  %v3506_v18 = vld [vmem:[#allocation8 + $0x128] sm:$0xff]   ;;  %s4574_s21 = scalar_lea.sflag [#allocation5], %s352_s3  ;;  %s3825_s24 = smov [#allocation11]  }
 0x1e0   : > { %2817 = vmatprep.subr.bf16.mxu1 %v3494_v53  ;;  %3109 = vmatprep.subr.bf16.mxu0 %v3495_v54  ;;  %v3501_v61 = vld [vmem:[#allocation8 + $0x158] sm:$0xff]   ;;  %v3504_v0 = vld [vmem:[#allocation8 + $0x160] sm:$0xff]   ;;  %v3507_v3 = vld [vmem:[#allocation8 + $0x168] sm:$0xff]   ;;  %s3689_s1 = sshll.u32 %s3825_s24, 4  ;;  %s3690_s1 = int_to_ptr.vmem [resolvable:$false] %s3689_s1 }
 0x1e1   : > { %v3502_v62 = vld [vmem:[#allocation8 + $0xd8] sm:$0xff]   ;;  %v3505_v2 = vld [vmem:[#allocation8 + $0xe0] sm:$0xff]   ;;  %v3508_v4 = vld [vmem:[#allocation8 + $0xe8] sm:$0xff]   ;;  %p3692_p8 = scmp.lt.s32.totalorder %s4567_s16, %s3690_s1 }
 0x1e2   : > { %v3509_v5 = vld [vmem:[#allocation8 + $0x130] sm:$0xff]   ;;  %v3512_v8 = vld [vmem:[#allocation8 + $0x138] sm:$0xff]   ;;  %v3515_v12 = vld [vmem:[#allocation8 + $0x80] sm:$0xff]  }
 0x1e3   : > { %2818 = vmatpush3.bf16.msra.mxu1 %v3496_v55  ;;  %3110 = vmatpush3.bf16.msra.mxu0 %v3495_v54  ;;  %v3510_v6 = vld [vmem:[#allocation8 + $0x170] sm:$0xff]   ;;  %v4297_v10 = vld [vmem:[#allocation2 + $0x28] sm:$0xff]  ;;  %v4301_v13 = vld [vmem:[#allocation2 + $0x18] sm:$0xff]  ;;  %s2749_s23 = sshll.u32 %s4693_s13, 5 }
 0x1e4   : > { %2819 = vmatprep.subr.bf16.mxu1 %v3497_v56  ;;  %3111 = vmatprep.subr.bf16.mxu0 %v3498_v57  ;;  %v3511_v7 = vld [vmem:[#allocation8 + $0xf0] sm:$0xff]   ;;  %v3513_v11 = vld [vmem:[#allocation8 + $0x178] sm:$0xff]   ;;  %v3516_v15 = vld [vmem:[#allocation8 + $0x88] sm:$0xff]   ;;  %s2484_s19 = sadd.s32 %s2756_s20, %s2749_s23 }
 0x1e5   : > { %v4295_v9 = vld [vmem:[#allocation2 + $0x20] sm:$0xff]  ;;  %3123 = vmatprep.mubr.bf16.mxu0 %v4297_v10  ;;  %v3514_v47 = vld [vmem:[#allocation8 + $0xf8] sm:$0xff]   ;;  %v4305_v16 = vld [vmem:[#allocation2 + $0x38] sm:$0xff]  ;;  %s2750_s30 = sshll.u32 %s2484_s19, 7 }
 0x1e6   : > { %1243 = vmatprep.mubr.bf16.mxu1 %v4295_v9  ;;  %v4303_v14 = vld [vmem:[#allocation2 + $0x40] sm:$0xff]  ;;  %v4307_v17 = vld [vmem:[#allocation2 + $0x58] sm:$0xff]  ;;  %v3522_v20 = vld [vmem:[#allocation8 + $0x40] sm:$0xff]   ;;  %s4565_s12 = scalar_lea.hbm %s4695_s6, %s2750_s30 }
 0x1e7   : > { %2820 = vmatpush3.bf16.msra.mxu1 %v3499_v58  ;;  %3112 = vmatpush3.bf16.msra.mxu0 %v3498_v57  ;;  %v3517_v19 = vld [vmem:[#allocation8 + $0x90] sm:$0xff]   ;;  %v3523_v21 = vld [vmem:[#allocation8] sm:$0xff]   ;;  %v3518_v24 = vld [vmem:[#allocation8 + $0x98] sm:$0xff]  }
 0x1e8   : > { %2821 = vmatprep.subr.bf16.mxu1 %v3500_v60  ;;  %3113 = vmatprep.subr.bf16.mxu0 %v3501_v61  ;;  %v4313_v22 = vld [vmem:[#allocation2 + $0x30] sm:$0xff]  ;;  %v4319_v26 = vld [vmem:[#allocation2 + $0x88] sm:$0xff]  ;;  %v3527_v27 = vld [vmem:[#allocation8 + $0x48] sm:$0xff]  }
 0x1e9   : > { %v4315_v23 = vld [vmem:[#allocation2 + $0x70] sm:$0xff]  ;;  %v3528_v28 = vld [vmem:[#allocation8 + $0x8] sm:$0xff]   ;;  %v4325_v30 = vld [vmem:[#allocation2 + $0x48] sm:$0xff] }
 0x1ea   : > { %v4317_v25 = vld [vmem:[#allocation2 + $0x50] sm:$0xff]  ;;  %v4327_v31 = vld [vmem:[#allocation2 + $0xa0] sm:$0xff]  ;;  %v3520_v32 = vld [vmem:[#allocation8 + $0xa8] sm:$0xff]  }
 0x1eb   : > { %2822 = vmatpush3.bf16.msra.mxu1 %v3502_v62  ;;  %3114 = vmatpush3.bf16.msra.mxu0 %v3501_v61  ;;  %v3519_v29 = vld [vmem:[#allocation8 + $0xa0] sm:$0xff]   ;;  %v3531_v33 = vld [vmem:[#allocation8 + $0x50] sm:$0xff]   ;;  %v4329_v34 = vld [vmem:[#allocation2 + $0x68] sm:$0xff] }
 0x1ec   : > { %2823 = vmatprep.subr.bf16.mxu1 %v3503_v63  ;;  %3115 = vmatprep.subr.bf16.mxu0 %v3504_v0  ;;  %v4331_v35 = vld [vmem:[#allocation2 + $0xb8] sm:$0xff]  ;;  %v3533_v36 = vld [vmem:[#allocation8 + $0x10] sm:$0xff]   ;;  %v3535_v37 = vld [vmem:[#allocation8 + $0x58] sm:$0xff]  }
 0x1ed   : > { %v3521_v38 = vld [vmem:[#allocation8 + $0xb0] sm:$0xff]   ;;  %v3537_v40 = vld [vmem:[#allocation8 + $0x18] sm:$0xff]   ;;  %v4339_v41 = vld [vmem:[#allocation2 + $0xd0] sm:$0xff] }
 0x1ee   : > { %v4337_v39 = vld [vmem:[#allocation2 + $0x60] sm:$0xff]  ;;  %v3524_v42 = vld [vmem:[#allocation8 + $0xb8] sm:$0xff]   ;;  %v923_v45 = vld [vmem:[#allocation2 + $0x10] sm:$0xff] }
 0x1ef   : > { %2824 = vmatpush3.bf16.msra.mxu1 %v3505_v2  ;;  %3116 = vmatpush3.bf16.msra.mxu0 %v3504_v0  ;;  %v4341_v43 = vld [vmem:[#allocation2 + $0x80] sm:$0xff]  ;;  %v3539_v46 = vld [vmem:[#allocation8 + $0x60] sm:$0xff]   ;;  %v3543_v48 = vld [vmem:[#allocation8 + $0x68] sm:$0xff]  }
 0x1f0   : > { %2825 = vmatprep.subr.bf16.mxu1 %v3506_v18  ;;  %3117 = vmatprep.subr.bf16.mxu0 %v3507_v3  ;;  %v3541_v59 = vld [vmem:[#allocation8 + $0x20] sm:$0xff]   ;;  %v4346_v49 = vld [vmem:[#allocation2 + $0x78] sm:$0xff]  ;;  %v3547_v53 = vld [vmem:[#allocation8 + $0x70] sm:$0xff]  }
 0x1f1   : > { %v3525_v1 = vld [vmem:[#allocation8 + $0x1c0] sm:$0xff]   ;;  %v3529_v52 = vld [vmem:[#allocation8 + $0x1c8] sm:$0xff]   ;;  %v3532_v55 = vld [vmem:[#allocation8 + $0x1d0] sm:$0xff]  }
 0x1f2   : > { %v3526_v44 = vld [vmem:[#allocation8 + $0x180] sm:$0xff]   ;;  %v4348_v50 = vld [vmem:[#allocation2 + $0x98] sm:$0xff]  ;;  %v3549_v56 = vld [vmem:[#allocation8 + $0x30] sm:$0xff]  }
 0x1f3   : > { %2826 = vmatpush3.bf16.msra.mxu1 %v3508_v4  ;;  %3118 = vmatpush3.bf16.msra.mxu0 %v3507_v3  ;;  %v3545_v51 = vld [vmem:[#allocation8 + $0x28] sm:$0xff]   ;;  %v4354_v57 = vld [vmem:[#allocation2 + $0x90] sm:$0xff]  ;;  %v3534_v58 = vld [vmem:[#allocation8 + $0x190] sm:$0xff]  }
 0x1f4   : > { %2827 = vmatprep.subr.bf16.mxu1 %v3509_v5  ;;  %3119 = vmatprep.subr.bf16.mxu0 %v3510_v6  ;;  %v3530_v54 = vld [vmem:[#allocation8 + $0x188] sm:$0xff]   ;;  %v3536_v60 = vld [vmem:[#allocation8 + $0x1d8] sm:$0xff]   ;;  %v4356_v61 = vld [vmem:[#allocation2 + $0xb0] sm:$0xff] }
 0x1f5   : > { %v3551_v62 = vld [vmem:[#allocation8 + $0x78] sm:$0xff]   ;;  %v3540_v2 = vld [vmem:[#allocation8 + $0x1e0] sm:$0xff]   ;;  %v3544_v4 = vld [vmem:[#allocation8 + $0x1e8] sm:$0xff]  }
 0x1f6   : > { %v3553_v63 = vld [vmem:[#allocation8 + $0x38] sm:$0xff]   ;;  %v3542_v3 = vld [vmem:[#allocation8 + $0x1a0] sm:$0xff]  }
 0x1f7   : > { %2828 = vmatpush3.bf16.msra.mxu1 %v3511_v7  ;;  %3120 = vmatpush3.bf16.msra.mxu0 %v3510_v6  ;;  %v3538_v0 = vld [vmem:[#allocation8 + $0x198] sm:$0xff]   ;;  %v3546_v6 = vld [vmem:[#allocation8 + $0x1a8] sm:$0xff]   ;;  %v3548_v7 = vld [vmem:[#allocation8 + $0x1f0] sm:$0xff]  }
 0x1f8   : > { %2829 = vmatprep.subr.bf16.mxu1 %v3512_v8  ;;  %3121 = vmatprep.subr.bf16.mxu0 %v3513_v11  ;;  %v4362_v18 = vld [vmem:[#allocation2 + $0xa8] sm:$0xff]  ;;  %v4370_v8 = vld [vmem:[#allocation2 + $0xc0] sm:$0xff] }
 0x1f9   : > { %v4364_v5 = vld [vmem:[#allocation2 + $0xc8] sm:$0xff] }
 0x1fb   : > { %2830 = vmatpush3.bf16.msra.mxu1 %v3514_v47  ;;  %3122 = vmatpush3.bf16.msra.mxu0 %v3513_v11  ;;  %v3552_v11 = vld [vmem:[#allocation8 + $0x1f8] sm:$0xff]  }
 0x1fc   : > { %3139 = vmatprep.subr.bf16.mxu0 %v3515_v12  ;;  %2895 = vmatprep.subr.bf16.mxu1 %v3522_v20  ;;  %v922_v47 = vld [vmem:[#allocation2 + $0x8] sm:$0xff]  ;;  %v3556_v20 = vld [vmem:[#allocation8 + $0x208] sm:$0xff]  }
 0x1fe   : > { %1244 = vmatmul.mubr.bf16.vlgmr.msra.gmra.mrb[4].mxu1 %v4301_v13  ;;  %3124 = vmatmul.mubr.bf16.vlgmr.msra.gmra.mrb[16].mxu0 %v4303_v14 }
 0x1ff   : > { %3140 = vmatpush3.bf16.msra.mxu0 %v3515_v12  ;;  %1251 = vmatprep.mubr.bf16.mxu1 %v4305_v16  ;;  %v3554_v12 = vld [vmem:[#allocation8 + $0x1b8] sm:$0xff]  }
 0x200   : > { %3141 = vmatprep.subr.bf16.mxu0 %v3516_v15  ;;  %3127 = vmatprep.mubr.bf16.mxu0 %v4307_v17 }
 0x201   : > { %2896 = vmatpush3.bf16.msra.mxu1 %v3523_v21  ;;  %v3557_v21 = vld [vmem:[#allocation8 + $0x210] sm:$0xff]  }
 0x202   : > { %2897 = vmatprep.subr.bf16.mxu1 %v3527_v27  ;;  %v3559_v27 = vld [vmem:[#allocation8 + $0x220] sm:$0xff]  }
 0x203   : > { %3142 = vmatpush3.bf16.msra.mxu0 %v3516_v15  ;;  %v3555_v15 = vld [vmem:[#allocation8 + $0x200] sm:$0xff]  }
 0x204   : > { %3143 = vmatprep.subr.bf16.mxu0 %v3517_v19 }
 0x205   : > { %2898 = vmatpush3.bf16.msra.mxu1 %v3528_v28  ;;  %v1767_v28 = vld [vmem:[#allocation2 + $0xe8] sm:$0xff] }
 0x206   : > { %1252 = vmatmul.mubr.bf16.gmra.mrb[8].mxu1 %v4313_v22  ;;  %3128 = vmatmul.mubr.bf16.gmra.mrb[20].mxu0 %v4315_v23 }
 0x207   : > { %3144 = vmatpush3.bf16.msra.mxu0 %v3517_v19  ;;  %1259 = vmatprep.mubr.bf16.mxu1 %v4317_v25  ;;  %v921_v19 = vld [vmem:[#allocation2] sm:$0xff] }
 0x208   : > { %3145 = vmatprep.subr.bf16.mxu0 %v3518_v24  ;;  %3131 = vmatprep.mubr.bf16.mxu0 %v4319_v26 }
 0x209   : > { %2899 = vmatprep.subr.bf16.mxu1 %v3531_v33 }
 0x20a   : > { %2900 = vmatpush3.bf16.msra.mxu1 %v3533_v36 }
 0x20b   : > { %3146 = vmatpush3.bf16.msra.mxu0 %v3518_v24  ;;  %2901 = vmatprep.subr.bf16.mxu1 %v3535_v37  ;;  %v3558_v24 = vld [vmem:[#allocation8 + $0x218] sm:$0xff]  }
 0x20c   : > { %3147 = vmatprep.subr.bf16.mxu0 %v3519_v29 }
 0x20e   : > { %1260 = vmatmul.mubr.bf16.gmra.mrb[12].mxu1 %v4325_v30  ;;  %3132 = vmatmul.mubr.bf16.gmra.mrb[24].mxu0 %v4327_v31 }
 0x20f   : > { %3148 = vmatpush3.bf16.msra.mxu0 %v3519_v29  ;;  %1267 = vmatprep.mubr.bf16.mxu1 %v4329_v34  ;;  %v3563_v29 = vld [vmem:[#allocation9] sm:$0xff]  }
 0x210   : > { %3149 = vmatprep.subr.bf16.mxu0 %v3520_v32  ;;  %3135 = vmatprep.mubr.bf16.mxu0 %v4331_v35 }
 0x211   : > { %2902 = vmatpush3.bf16.msra.mxu1 %v3537_v40 }
 0x212   : > { %2903 = vmatprep.subr.bf16.mxu1 %v3539_v46 }
 0x213   : > { %3150 = vmatpush3.bf16.msra.mxu0 %v3520_v32 }
 0x214   : > { %3151 = vmatprep.subr.bf16.mxu0 %v3521_v38 }
 0x215   : > { %2904 = vmatpush3.bf16.msra.mxu1 %v3541_v59 }
 0x216   : > { %1268 = vmatmul.mubr.bf16.gmra.mrb[16].mxu1 %v4337_v39  ;;  %3136 = vmatmul.mubr.bf16.gmra.mrb[28].mxu0 %v4339_v41 }
 0x217   : > { %3152 = vmatpush3.bf16.msra.mxu0 %v3521_v38  ;;  %1275 = vmatprep.mubr.bf16.mxu1 %v4341_v43  ;;  %v3570_v38 = vld [vmem:[#allocation9 + $0x38] sm:$0xff]  }
 0x218   : > { %3153 = vmatprep.subr.bf16.mxu0 %v3524_v42  ;;  %3155 = vmatprep.mubr.bf16.mxu0 %v923_v45 }
 0x219   : > { %2905 = vmatprep.subr.bf16.mxu1 %v3543_v48 }
 0x21a   : > { %2906 = vmatpush3.bf16.msra.mxu1 %v3545_v51 }
 0x21b   : > { %3154 = vmatpush3.bf16.msra.mxu0 %v3524_v42  ;;  %2907 = vmatprep.subr.bf16.mxu1 %v3547_v53 }
 0x21c   : > { %2975 = vmatprep.subr.bf16.mxu0 %v3525_v1 }
 0x21e   : > { %1276 = vmatmul.mubr.bf16.gmra.mrb[20].mxu1 %v4346_v49  ;;  %3156 = vmatmul.mubr.bf16.vlgmr.msra.gmra.mrb[16].mxu0 %v4297_v10  ;;  %v3550_v10 = vld [vmem:[#allocation8 + $0x1b0] sm:$0xff]  }
 0x21f   : > { %2976 = vmatpush3.bf16.msra.mxu0 %v3526_v44  ;;  %1283 = vmatprep.mubr.bf16.mxu1 %v4348_v50 }
 0x220   : > { %2977 = vmatprep.subr.bf16.mxu0 %v3529_v52  ;;  %3159 = vmatprep.mubr.bf16.mxu0 %v4303_v14 }
 0x221   : > { %2908 = vmatpush3.bf16.msra.mxu1 %v3549_v56 }
 0x222   : > { %2909 = vmatprep.subr.bf16.mxu1 %v3551_v62 }
 0x223   : > { %2978 = vmatpush3.bf16.msra.mxu0 %v3530_v54 }
 0x224   : > { %2979 = vmatprep.subr.bf16.mxu0 %v3532_v55 }
 0x225   : > { %2910 = vmatpush3.bf16.msra.mxu1 %v3553_v63 }
 0x226   : > { %1284 = vmatmul.mubr.bf16.gmra.mrb[24].mxu1 %v4354_v57  ;;  %3160 = vmatmul.mubr.bf16.gmra.mrb[20].mxu0 %v4307_v17 }
 0x227   : > { %2980 = vmatpush3.bf16.msra.mxu0 %v3534_v58  ;;  %1291 = vmatprep.mubr.bf16.mxu1 %v4356_v61 }
 0x228   : > { %2981 = vmatprep.subr.bf16.mxu0 %v3536_v60  ;;  %3163 = vmatprep.mubr.bf16.mxu0 %v4315_v23 }
 0x229   : > { %3203 = vmatprep.subr.bf16.mxu1 %v3563_v29 }
 0x22b   : > { %2982 = vmatpush3.bf16.msra.mxu0 %v3538_v0 }
 0x22c   : > { %2983 = vmatprep.subr.bf16.mxu0 %v3540_v2 }
 0x22e   : > { %1292 = vmatmul.mubr.bf16.gmra.mrb[28].mxu1 %v4362_v18  ;;  %3164 = vmatmul.mubr.bf16.gmra.mrb[24].mxu0 %v4319_v26 }
 0x22f   : > { %2984 = vmatpush3.bf16.msra.mxu0 %v3542_v3  ;;  %1299 = vmatprep.mubr.bf16.mxu1 %v4364_v5 }
 0x230   : > { %2985 = vmatprep.subr.bf16.mxu0 %v3544_v4  ;;  %3167 = vmatprep.mubr.bf16.mxu0 %v4327_v31 }
 0x233   : > { %2986 = vmatpush3.bf16.msra.mxu0 %v3546_v6 }
 0x234   : > { %2987 = vmatprep.subr.bf16.mxu0 %v3548_v7 }
 0x236   : > { %1300 = vmatmul.mubr.bf16.gmra.mrb[32].mxu1 %v4370_v8  ;;  %3168 = vmatmul.mubr.bf16.gmra.mrb[28].mxu0 %v4331_v35 }
 0x237   : > { %2988 = vmatpush3.bf16.msra.mxu0 %v3550_v10  ;;  %1581 = vmatprep.mubr.bf16.mxu1 %v922_v47 }
 0x238   : > { %2989 = vmatprep.subr.bf16.mxu0 %v3552_v11  ;;  %1993 = vmatprep.mubr.bf16.mxu0 %v4305_v16 }
 0x23b   : > { %2990 = vmatpush3.bf16.msra.mxu0 %v3554_v12 }
 0x23c   : > { %3171 = vmatprep.subr.bf16.mxu0 %v3555_v15 }
 0x23e   : > { %1582 = vmatmul.mubr.bf16.vlgmr.msra.gmra.mrb[36].mxu1 %v921_v19  ;;  %1994 = vmatmul.mubr.bf16.vlgmr.msra.gmra.mrb[32].mxu0 %v4313_v22 }
 0x23f   : > { %3172 = vmatpush3.bf16.msra.mxu0 %v3555_v15  ;;  %1589 = vmatprep.mubr.bf16.mxu1 %v4295_v9  ;;  %v3560_v9 = vld [vmem:[#allocation8 + $0x228] sm:$0xff]  }
 0x240   : > { %2001 = vmatprep.mubr.bf16.mxu0 %v4317_v25  ;;  %3173 = vmatprep.subr.bf16.mxu0 %v3556_v20 }
 0x241   : > { %3204 = vmatpush3.bf16.msra.mxu1 %v3563_v29 }
 0x243   : > { %3174 = vmatpush3.bf16.msra.mxu0 %v3556_v20 }
 0x244   : > { %3175 = vmatprep.subr.bf16.mxu0 %v3557_v21 }
 0x246   : > { %1590 = vmatmul.mubr.bf16.gmra.mrb[40].mxu1 %v4301_v13  ;;  %2002 = vmatmul.mubr.bf16.gmra.mrb[36].mxu0 %v4325_v30  ;;  %v3561_v13 = vld [vmem:[#allocation8 + $0x230] sm:$0xff]  }
 0x247   : > { %1597 = vmatprep.mubr.bf16.mxu1 %v4305_v16  ;;  %2009 = vmatprep.mubr.bf16.mxu0 %v4329_v34  ;;  %v3562_v16 = vld [vmem:[#allocation8 + $0x238] sm:$0xff]  }
 0x248   : > { %3176 = vmatpush3.bf16.msra.mxu0 %v3557_v21 }
 0x249   : > { %3177 = vmatprep.subr.bf16.mxu0 %v3558_v24 }
 0x24c   : > { %3178 = vmatpush3.bf16.msra.mxu0 %v3558_v24 }
 0x24d   : > { %3179 = vmatprep.subr.bf16.mxu0 %v3559_v27 }
 0x24e   : > { %1598 = vmatmul.mubr.bf16.gmra.mrb[44].mxu1 %v4313_v22  ;;  %2010 = vmatmul.mubr.bf16.gmra.mrb[40].mxu0 %v4337_v39  ;;  %v1766_v22 = vld [vmem:[#allocation2 + $0xe0] sm:$0xff] }
 0x24f   : > { %1605 = vmatprep.mubr.bf16.mxu1 %v4317_v25  ;;  %2017 = vmatprep.mubr.bf16.mxu0 %v4341_v43  ;;  %v1765_v25 = vld [vmem:[#allocation2 + $0xd8] sm:$0xff] }
 0x250   : > { %3180 = vmatpush3.bf16.msra.mxu0 %v3559_v27 }
 0x251   : > { %3181 = vmatprep.subr.bf16.mxu0 %v3560_v9 }
 0x254   : > { %3182 = vmatpush3.bf16.msra.mxu0 %v3560_v9 }
 0x255   : > { %3183 = vmatprep.subr.bf16.mxu0 %v3561_v13 }
 0x256   : > { %1606 = vmatmul.mubr.bf16.gmra.mrb[48].mxu1 %v4325_v30  ;;  %2018 = vmatmul.mubr.bf16.gmra.mrb[44].mxu0 %v4346_v49  ;;  %v3564_v30 = vld [vmem:[#allocation9 + $0x8] sm:$0xff]  }
 0x257   : > { %1613 = vmatprep.mubr.bf16.mxu1 %v4329_v34  ;;  %2025 = vmatprep.mubr.bf16.mxu0 %v4348_v50 }
 0x258   : > { %3184 = vmatpush3.bf16.msra.mxu0 %v3561_v13  ;;  %3205 = vmatprep.subr.bf16.mxu1 %v3564_v30 }
 0x259   : > { %3185 = vmatprep.subr.bf16.mxu0 %v3562_v16  ;;  %3206 = vmatpush3.bf16.msra.mxu1 %v3564_v30 }
 0x25c   : > { %3186 = vmatpush3.bf16.msra.mxu0 %v3562_v16 }
 0x25e   : > { %1614 = vmatmul.mubr.bf16.gmra.mrb[52].mxu1 %v4337_v39  ;;  %2026 = vmatmul.mubr.bf16.gmra.mrb[48].mxu0 %v4354_v57 }
 0x25f   : > { %1621 = vmatprep.mubr.bf16.mxu1 %v4341_v43  ;;  %2033 = vmatprep.mubr.bf16.mxu0 %v4356_v61 }
 0x266   : > { %1622 = vmatmul.mubr.bf16.gmra.mrb[56].mxu1 %v4346_v49  ;;  %2034 = vmatmul.mubr.bf16.gmra.mrb[52].mxu0 %v4362_v18 }
 0x267   : > { %1629 = vmatprep.mubr.bf16.mxu1 %v4348_v50  ;;  %2041 = vmatprep.mubr.bf16.mxu0 %v4364_v5 }
 0x26e   : > { %1630 = vmatmul.mubr.bf16.gmra.mrb[60].mxu1 %v4354_v57  ;;  %2042 = vmatmul.mubr.bf16.gmra.mrb[56].mxu0 %v4370_v8 }
 0x26f   : > { %1637 = vmatprep.mubr.bf16.mxu1 %v4356_v61  ;;  %2049 = vmatprep.mubr.bf16.mxu0 %v1766_v22 }
 0x276   : > { %1638 = vmatmul.mubr.bf16.gmra.mrb[64].mxu1 %v4362_v18  ;;  %2050 = vmatmul.mubr.bf16.gmra.mrb[60].mxu0 %v1765_v25 }
 0x277   : > { %3187 = vmatprep.mubr.bf16.mxu0 %v4303_v14  ;;  %v3565_v14 = vld [vmem:[#allocation9 + $0x10] sm:$0xff]  }
 0x278   : > { %3207 = vmatprep.subr.bf16.mxu1 %v3565_v14 }
 0x279   : > { %3208 = vmatpush3.bf16.msra.mxu1 %v3565_v14 }
 0x27e   : > { %3188 = vmatmul.mubr.bf16.vlgmr.msra.gmra.mrb[16].mxu0 %v4307_v17  ;;  %v3566_v17 = vld [vmem:[#allocation9 + $0x18] sm:$0xff]  }
 0x27f   : > { %3191 = vmatprep.mubr.bf16.mxu0 %v4315_v23  ;;  %3209 = vmatprep.subr.bf16.mxu1 %v3566_v17  ;;  %v3567_v23 = vld [vmem:[#allocation9 + $0x20] sm:$0xff]  }
 0x280   : > { %3210 = vmatpush3.bf16.msra.mxu1 %v3566_v17 }
 0x281   : > { %3211 = vmatprep.subr.bf16.mxu1 %v3567_v23 }
 0x284   : > { %3212 = vmatpush3.bf16.msra.mxu1 %v3567_v23 }
 0x286   : > { %3192 = vmatmul.mubr.bf16.gmra.mrb[20].mxu0 %v4319_v26  ;;  %v3568_v26 = vld [vmem:[#allocation9 + $0x28] sm:$0xff]  }
 0x287   : > { %3195 = vmatprep.mubr.bf16.mxu0 %v4327_v31  ;;  %3213 = vmatprep.subr.bf16.mxu1 %v3568_v26  ;;  %v3569_v31 = vld [vmem:[#allocation9 + $0x30] sm:$0xff]  }
 0x288   : > { %3214 = vmatpush3.bf16.msra.mxu1 %v3568_v26 }
 0x289   : > { %3215 = vmatprep.subr.bf16.mxu1 %v3569_v31 }
 0x28c   : > { %3216 = vmatpush3.bf16.msra.mxu1 %v3569_v31 }
 0x28d   : > { %3217 = vmatprep.subr.bf16.mxu1 %v3570_v38 }
 0x28e   : > { %3196 = vmatmul.mubr.bf16.gmra.mrb[24].mxu0 %v4331_v35 }
 0x28f   : > { %3199 = vmatprep.mubr.bf16.mxu0 %v4339_v41 }
 0x290   : > { %3218 = vmatpush3.bf16.msra.mxu1 %v3570_v38 }
 0x296   : > { %3200 = vmatmul.mubr.bf16.gmra.mrb[28].mxu0 %v1767_v28 }
 0x2d1   : > { %v2831_v32 = vpop.f32.mrb[4].mxu1 }
 0x2d2   : > { %v2832_v33 = vpop.f32.mrb[5].mxu1 }
 0x2d3   : > { %v2833_v34 = vadd.f32 %v2832_v33, %v2831_v32  ;;  %v2834_v35 = vpop.f32.mrb[6].mxu1 }
 0x2d4   : > { %v2835_v36 = vpop.f32.mrb[7].mxu1 }
 0x2d5   : > { %v2836_v37 = vadd.f32 %v2835_v36, %v2834_v35 }
 0x2d9   : > { %v2837_v39 = vpop.f32.mrb[8].mxu1 }
 0x2da   : > { %v2838_v40 = vpop.f32.mrb[9].mxu1 }
 0x2db   : > { %v4409_v41 = vadd.f32 %v2838_v40, %v2837_v39  ;;  %v2840_v42 = vpop.f32.mrb[10].mxu1 }
 0x2dc   : > { %v2841_v43 = vpop.f32.mrb[11].mxu1 }
 0x2dd   : > { %v4411_v45 = vadd.f32 %v2841_v43, %v2840_v42 }
 0x2e1   : > { %v2843_v46 = vpop.f32.mrb[12].mxu1 }
 0x2e2   : > { %v2844_v59 = vpop.f32.mrb[13].mxu1 }
 0x2e3   : > { %v4413_v48 = vadd.f32 %v2844_v59, %v2843_v46  ;;  %v2846_v1 = vpop.f32.mrb[14].mxu1 }
 0x2e4   : > { %v2847_v49 = vpop.f32.mrb[15].mxu1 }
 0x2e5   : > { %v4415_v44 = vadd.f32 %v2847_v49, %v2846_v1 }
 0x2e9   : > { %v2849_v52 = vpop.f32.mrb[16].mxu1 }
 0x2ea   : > { %v2850_v50 = vpop.f32.mrb[17].mxu1 }
 0x2eb   : > { %v4417_v51 = vadd.f32 %v2850_v50, %v2849_v52  ;;  %v2852_v53 = vpop.f32.mrb[18].mxu1 }
 0x2ec   : > { %v2853_v54 = vpop.f32.mrb[19].mxu1 }
 0x2ed   : > { %v4419_v55 = vadd.f32 %v2853_v54, %v2852_v53 }
 0x2f1   : > { %v2855_v56 = vpop.f32.mrb[20].mxu1 }
 0x2f2   : > { %v2856_v57 = vpop.f32.mrb[21].mxu1 }
 0x2f3   : > { %v4421_v58 = vadd.f32 %v2856_v57, %v2855_v56  ;;  %v2858_v60 = vpop.f32.mrb[22].mxu1 }
 0x2f4   : > { %v2859_v61 = vpop.f32.mrb[23].mxu1 }
 0x2f5   : > { %v4423_v62 = vadd.f32 %v2859_v61, %v2858_v60 }
 0x2f9   : > { %v2861_v63 = vpop.f32.mrb[24].mxu1 }
 0x2fa   : > { %v2862_v0 = vpop.f32.mrb[25].mxu1 }
 0x2fb   : > { %v4425_v2 = vadd.f32 %v2862_v0, %v2861_v63  ;;  %v2864_v18 = vpop.f32.mrb[26].mxu1 }
 0x2fc   : > { %v2865_v3 = vpop.f32.mrb[27].mxu1 }
 0x2fd   : > { %v4427_v4 = vadd.f32 %v2865_v3, %v2864_v18 }
 0x301   : > { %v2867_v5 = vpop.f32.mrb[28].mxu1 }
 0x302   : > { %v2868_v6 = vpop.f32.mrb[29].mxu1 }
 0x303   : > { %v4429_v7 = vadd.f32 %v2868_v6, %v2867_v5  ;;  %v2870_v8 = vpop.f32.mrb[30].mxu1 }
 0x304   : > { %v2871_v10 = vpop.f32.mrb[31].mxu1 }
 0x305   : > { %v4431_v11 = vadd.f32 %v2871_v10, %v2870_v8 }
 0x309   : > { %v2873_v47 = vpop.f32.mrb[32].mxu1 }
 0x30a   : > { %v2874_v12 = vpop.f32.mrb[33].mxu1 }
 0x30b   : > { %v4433_v15 = vadd.f32 %v2874_v12, %v2873_v47  ;;  %v2876_v19 = vpop.f32.mrb[34].mxu1 }
 0x30c   : > { %v2877_v20 = vpop.f32.mrb[35].mxu1 }
 0x30d   : > { %v4435_v21 = vadd.f32 %v2877_v20, %v2876_v19 }
 0x311   : > { %v2911_v24 = vpop.f32.mrb[36].mxu1  ;;  %v2991_v27 = vpop.f32.mrb[32].mxu0 }
 0x312   : > { %v2912_v9 = vpop.f32.mrb[37].mxu1  ;;  %v2992_v13 = vpop.f32.mrb[33].mxu0 }
 0x313   : > { %v2913_v16 = vadd.f32 %v2912_v9, %v2911_v24  ;;  %v2993_v22 = vadd.f32 %v2992_v13, %v2991_v27  ;;  %v2914_v25 = vpop.f32.mrb[38].mxu1  ;;  %v2994_v28 = vpop.f32.mrb[34].mxu0 }
 0x314   : > { %v2915_v29 = vpop.f32.mrb[39].mxu1  ;;  %v2995_v30 = vpop.f32.mrb[35].mxu0 }
 0x315   : > { %v3254_v14 = vadd.f32 %v2913_v16, %v2833_v34  ;;  %v2916_v17 = vadd.f32 %v2915_v29, %v2914_v25  ;;  %v2996_v23 = vadd.f32 %v2995_v30, %v2994_v28 }
 0x317   : > { %v3260_v26 = vadd.f32 %v2916_v17, %v2836_v37  ;;  %v4437_v31 = vadd.f32 %v3254_v14, %v2993_v22 }
 0x319   : > { %v2917_v32 = vpop.f32.mrb[40].mxu1  ;;  %v2997_v33 = vpop.f32.mrb[36].mxu0  ;;  %v4439_v35 = vadd.f32 %v3260_v26, %v2996_v23 }
 0x31a   : > { %v2918_v36 = vpop.f32.mrb[41].mxu1  ;;  %v2998_v38 = vpop.f32.mrb[37].mxu0 }
 0x31b   : > { %v2919_v39 = vadd.f32 %v2918_v36, %v2917_v32  ;;  %v2999_v40 = vadd.f32 %v2998_v38, %v2997_v33  ;;  %v2920_v42 = vpop.f32.mrb[42].mxu1  ;;  %v3000_v43 = vpop.f32.mrb[38].mxu0 }
 0x31c   : > { %v2921_v46 = vpop.f32.mrb[43].mxu1  ;;  %v3001_v59 = vpop.f32.mrb[39].mxu0 }
 0x31d   : > { %v3251_v1 = vadd.f32 %v2919_v39, %v4409_v41  ;;  %v2922_v34 = vadd.f32 %v2921_v46, %v2920_v42  ;;  %v3002_v49 = vadd.f32 %v3001_v59, %v3000_v43 }
 0x31f   : > { %v3257_v37 = vadd.f32 %v2922_v34, %v4411_v45  ;;  %v4443_v52 = vadd.f32 %v3251_v1, %v2999_v40 }
 0x321   : > { %v2923_v50 = vpop.f32.mrb[44].mxu1  ;;  %v3003_v53 = vpop.f32.mrb[40].mxu0  ;;  %v4445_v54 = vadd.f32 %v3257_v37, %v3002_v49 }
 0x322   : > { %v2924_v56 = vpop.f32.mrb[45].mxu1  ;;  %v3004_v57 = vpop.f32.mrb[41].mxu0 }
 0x323   : > { %v2925_v60 = vadd.f32 %v2924_v56, %v2923_v50  ;;  %v3005_v61 = vadd.f32 %v3004_v57, %v3003_v53  ;;  %v2926_v63 = vpop.f32.mrb[46].mxu1  ;;  %v3006_v0 = vpop.f32.mrb[42].mxu0 }
 0x324   : > { %v2927_v18 = vpop.f32.mrb[47].mxu1  ;;  %v3007_v3 = vpop.f32.mrb[43].mxu0 }
 0x325   : > { %v3266_v41 = vadd.f32 %v2925_v60, %v4413_v48  ;;  %v2928_v5 = vadd.f32 %v2927_v18, %v2926_v63  ;;  %v3008_v6 = vadd.f32 %v3007_v3, %v3006_v0 }
 0x327   : > { %v3272_v45 = vadd.f32 %v2928_v5, %v4415_v44  ;;  %v4449_v8 = vadd.f32 %v3266_v41, %v3005_v61 }
 0x329   : > { %v2929_v10 = vpop.f32.mrb[48].mxu1  ;;  %v3009_v47 = vpop.f32.mrb[44].mxu0  ;;  %v4451_v12 = vadd.f32 %v3272_v45, %v3008_v6 }
 0x32a   : > { %v2930_v19 = vpop.f32.mrb[49].mxu1  ;;  %v3010_v20 = vpop.f32.mrb[45].mxu0 }
 0x32b   : > { %v2931_v24 = vadd.f32 %v2930_v19, %v2929_v10  ;;  %v3011_v27 = vadd.f32 %v3010_v20, %v3009_v47  ;;  %v2932_v9 = vpop.f32.mrb[50].mxu1  ;;  %v3012_v13 = vpop.f32.mrb[46].mxu0 }
 0x32c   : > { %v2933_v16 = vpop.f32.mrb[51].mxu1  ;;  %v3013_v22 = vpop.f32.mrb[47].mxu0 }
 0x32d   : > { %v3263_v48 = vadd.f32 %v2931_v24, %v4417_v51  ;;  %v2934_v25 = vadd.f32 %v2933_v16, %v2932_v9  ;;  %v3014_v28 = vadd.f32 %v3013_v22, %v3012_v13 }
 0x32f   : > { %v3269_v44 = vadd.f32 %v2934_v25, %v4419_v55  ;;  %v4455_v29 = vadd.f32 %v3263_v48, %v3011_v27 }
 0x331   : > { %v2935_v30 = vpop.f32.mrb[52].mxu1  ;;  %v3015_v14 = vpop.f32.mrb[48].mxu0  ;;  %v4457_v17 = vadd.f32 %v3269_v44, %v3014_v28 }
 0x332   : > { %v2936_v23 = vpop.f32.mrb[53].mxu1  ;;  %v3016_v26 = vpop.f32.mrb[49].mxu0 }
 0x333   : > { %v2937_v32 = vadd.f32 %v2936_v23, %v2935_v30  ;;  %v3017_v33 = vadd.f32 %v3016_v26, %v3015_v14  ;;  %v2938_v36 = vpop.f32.mrb[54].mxu1  ;;  %v3018_v38 = vpop.f32.mrb[50].mxu0 }
 0x334   : > { %v2939_v39 = vpop.f32.mrb[55].mxu1  ;;  %v3019_v40 = vpop.f32.mrb[51].mxu0 }
 0x335   : > { %v3278_v51 = vadd.f32 %v2937_v32, %v4421_v58  ;;  %v2940_v42 = vadd.f32 %v2939_v39, %v2938_v36  ;;  %v3020_v43 = vadd.f32 %v3019_v40, %v3018_v38 }
 0x337   : > { %v3284_v55 = vadd.f32 %v2940_v42, %v4423_v62  ;;  %v4461_v46 = vadd.f32 %v3278_v51, %v3017_v33  ;;  %v4482_v51 = vld [vmem:[%s4691_s2] ss:$0 sm:$0xff]  ;;  %s3685_s2 = scalar_lea.vmem %s4567_s16, 2048 }
 0x338   : > { %p3686_p9 = scmp.ne.s32.totalorder %s4567_s16, %s3685_s2 }
 0x339   : > { %v2941_v59 = vpop.f32.mrb[56].mxu1  ;;  %v3021_v1 = vpop.f32.mrb[52].mxu0  ;;  %v4463_v34 = vadd.f32 %v3284_v55, %v3020_v43 }
 0x33a   : > { %v2942_v49 = vpop.f32.mrb[57].mxu1  ;;  %v3022_v37 = vpop.f32.mrb[53].mxu0 }
 0x33b   : > { %v2943_v50 = vadd.f32 %v2942_v49, %v2941_v59  ;;  %v3023_v53 = vadd.f32 %v3022_v37, %v3021_v1  ;;  %v2944_v56 = vpop.f32.mrb[58].mxu1  ;;  %v3024_v57 = vpop.f32.mrb[54].mxu0 }
 0x33c   : > { %v2945_v60 = vpop.f32.mrb[59].mxu1  ;;  %v3025_v61 = vpop.f32.mrb[55].mxu0 }
 0x33d   : > { %v3275_v58 = vadd.f32 %v2943_v50, %v4425_v2  ;;  %v2946_v63 = vadd.f32 %v2945_v60, %v2944_v56  ;;  %v3026_v0 = vadd.f32 %v3025_v61, %v3024_v57 }
 0x33f   : > { %v3281_v62 = vadd.f32 %v2946_v63, %v4427_v4  ;;  %v4467_v18 = vadd.f32 %v3275_v58, %v3023_v53 }
 0x341   : > { %v2947_v3 = vpop.f32.mrb[60].mxu1  ;;  %v3027_v41 = vpop.f32.mrb[56].mxu0  ;;  %v4469_v5 = vadd.f32 %v3281_v62, %v3026_v0 }
 0x342   : > { %v2948_v6 = vpop.f32.mrb[61].mxu1  ;;  %v3028_v45 = vpop.f32.mrb[57].mxu0 }
 0x343   : > { %v2949_v10 = vadd.f32 %v2948_v6, %v2947_v3  ;;  %v3029_v47 = vadd.f32 %v3028_v45, %v3027_v41  ;;  %v2950_v19 = vpop.f32.mrb[62].mxu1  ;;  %v3030_v20 = vpop.f32.mrb[58].mxu0 }
 0x344   : > { %v2951_v24 = vpop.f32.mrb[63].mxu1  ;;  %v3031_v27 = vpop.f32.mrb[59].mxu0 }
 0x345   : > { %v3290_v2 = vadd.f32 %v2949_v10, %v4429_v7  ;;  %v2952_v9 = vadd.f32 %v2951_v24, %v2950_v19  ;;  %v3032_v13 = vadd.f32 %v3031_v27, %v3030_v20 }
 0x347   : > { %v3296_v4 = vadd.f32 %v2952_v9, %v4431_v11  ;;  %v4473_v16 = vadd.f32 %v3290_v2, %v3029_v47 }
 0x349   : > { %v2953_v22 = vpop.f32.mrb[64].mxu1  ;;  %v3033_v48 = vpop.f32.mrb[60].mxu0  ;;  %v4475_v25 = vadd.f32 %v3296_v4, %v3032_v13 }
 0x34a   : > { %v2954_v28 = vpop.f32.mrb[65].mxu1  ;;  %v3034_v44 = vpop.f32.mrb[61].mxu0 }
 0x34b   : > { %v2955_v30 = vadd.f32 %v2954_v28, %v2953_v22  ;;  %v3035_v14 = vadd.f32 %v3034_v44, %v3033_v48  ;;  %v2956_v23 = vpop.f32.mrb[66].mxu1  ;;  %v3036_v26 = vpop.f32.mrb[62].mxu0 }
 0x34c   : > { %v2957_v32 = vpop.f32.mrb[67].mxu1  ;;  %v3037_v33 = vpop.f32.mrb[63].mxu0 }
 0x34d   : > { %v3287_v7 = vadd.f32 %v2955_v30, %v4433_v15  ;;  %v2958_v36 = vadd.f32 %v2957_v32, %v2956_v23  ;;  %v3038_v38 = vadd.f32 %v3037_v33, %v3036_v26 }
 0x34f   : > { %v3293_v11 = vadd.f32 %v2958_v36, %v4435_v21  ;;  %v3288_v39 = vadd.f32 %v3287_v7, %v3035_v14 }
 0x351   : > { %v3189_v40 = vpop.f32.mrb[16].mxu0  ;;  %v4484_v42 = vadd.f32 %v3293_v11, %v3038_v38 }
 0x352   : > { %v3253_v43 = vadd.f32 %v4443_v52, %v3189_v40  ;;  %v2092_v55 = vpop.f32.mrb[17].mxu0 }
 0x353   : > { %v3256_v59 = vadd.f32 %v4437_v31, %v2092_v55  ;;  %v3190_v1 = vpop.f32.mrb[18].mxu0 }
 0x354   : > { %v2180_v15 = vadd.f32 %v3253_v43, %v4482_v51  ;;  %v3259_v49 = vadd.f32 %v4445_v54, %v3190_v1  ;;  %v2095_v21 = vpop.f32.mrb[19].mxu0 }
 0x355   : > { %v2178_v37 = vadd.f32 %v3256_v59, %v4482_v51  ;;  %v3262_v50 = vadd.f32 %v4439_v35, %v2095_v21 }
 0x356   : > { %v2181_v53 = vadd.f32 %v3259_v49, %v4482_v51  ;;  %v2196_v57 = vmax.f32 %v2180_v15, 0.0 }
 0x357   : > { %v2179_v56 = vadd.f32 %v3262_v50, %v4482_v51  ;;  %v2194_v52 = vmax.f32 %v2178_v37, 0.0 }
 0x358   : > { %v2197_v60 = vmax.f32 %v2181_v53, 0.0 }
 0x359   : > { %v2195_v61 = vmax.f32 %v2179_v56, 0.0  ;;  %v3193_v58 = vpop.f32.mrb[20].mxu0  ;;  %v2789_v56 = vld [vmem:[%s4144_s15 + $0x8] sm:$0xff]  }
 0x35a   : > { %v2211_v31 = vpack.c.bf16 %v2197_v60, %v2196_v57  ;;  %v3265_v63 = vadd.f32 %v4455_v29, %v3193_v58  ;;  %v2108_v0 = vpop.f32.mrb[21].mxu0 }
 0x35b   : > { %v3268_v54 = vadd.f32 %v4449_v8, %v2108_v0  ;;  %v3194_v62 = vpop.f32.mrb[22].mxu0  ;;  %v2210_v3 = vpack.c.bf16 %v2195_v61, %v2194_v52  ;;  %v2760_v0 = vunpack.c.h.bf16 %v2789_v56 }
 0x35c   : > { %v2184_v41 = vadd.f32 %v3265_v63, %v4482_v51  ;;  %v3271_v35 = vadd.f32 %v4457_v17, %v3194_v62  ;;  %v2111_v6 = vpop.f32.mrb[23].mxu0 }
 0x35d   : > { %v2182_v45 = vadd.f32 %v3268_v54, %v4482_v51  ;;  %v3274_v10 = vadd.f32 %v4451_v12, %v2111_v6  ;;  %3219 = vmatprep.mubr.bf16.mxu1 %v2210_v3  ;;  %v2792_v6 = vld [vmem:[%s4144_s15 + $0x20] sm:$0xff]  }
 0x35e   : > { %v2185_v47 = vadd.f32 %v3271_v35, %v4482_v51  ;;  %3220 = vmatmul.mubr.bf16.vlgmr.msra.gmra.mrb[68].mxu1 %v2211_v31  ;;  %v2200_v19 = vmax.f32 %v2184_v41, 0.0 }
 0x35f   : > { %v2183_v29 = vadd.f32 %v3274_v10, %v4482_v51  ;;  %v2198_v8 = vmax.f32 %v2182_v45, 0.0 }
 0x360   : > { %v2201_v20 = vmax.f32 %v2185_v47, 0.0  ;;  %v2791_v47 = vld [vmem:[%s4144_s15 + $0x18] sm:$0xff]  }
 0x361   : > { %v2199_v24 = vmax.f32 %v2183_v29, 0.0  ;;  %v3197_v27 = vpop.f32.mrb[24].mxu0 }
 0x362   : > { %v3277_v2 = vadd.f32 %v4467_v18, %v3197_v27  ;;  %v2124_v9 = vpop.f32.mrb[25].mxu0  ;;  %v2213_v17 = vpack.c.bf16 %v2201_v20, %v2200_v19 }
 0x363   : > { %v3280_v13 = vadd.f32 %v4461_v46, %v2124_v9  ;;  %v3198_v4 = vpop.f32.mrb[26].mxu0  ;;  %v2212_v22 = vpack.c.bf16 %v2199_v24, %v2198_v8  ;;  %v2771_v8 = vunpack.c.l.bf16 %v2792_v6 }
 0x364   : > { %v2188_v12 = vadd.f32 %v3277_v2, %v4482_v51  ;;  %v3283_v48 = vadd.f32 %v4469_v5, %v3198_v4  ;;  %v2127_v28 = vpop.f32.mrb[27].mxu0  ;;  %v2767_v2 = vunpack.c.l.bf16 %v2791_v47 }
 0x365   : > { %v2186_v44 = vadd.f32 %v3280_v13, %v4482_v51  ;;  %v3286_v30 = vadd.f32 %v4463_v34, %v2127_v28  ;;  %3223 = vmatprep.mubr.bf16.mxu1 %v2212_v22  ;;  %v2772_v13 = vunpack.c.h.bf16 %v2792_v6 }
 0x366   : > { %v2189_v14 = vadd.f32 %v3283_v48, %v4482_v51  ;;  %3224 = vmatmul.mubr.bf16.gmra.mrb[72].mxu1 %v2213_v17  ;;  %v2204_v23 = vmax.f32 %v2188_v12, 0.0  ;;  %v2768_v12 = vunpack.c.h.bf16 %v2791_v47 }
 0x367   : > { %v2187_v18 = vadd.f32 %v3286_v30, %v4482_v51  ;;  %v2202_v46 = vmax.f32 %v2186_v44, 0.0 }
 0x368   : > { %v2205_v26 = vmax.f32 %v2189_v14, 0.0 }
 0x369   : > { %v2203_v32 = vmax.f32 %v2187_v18, 0.0  ;;  %v3201_v33 = vpop.f32.mrb[28].mxu0  ;;  %v2794_v18 = vld [vmem:[%s4144_s15 + $0x30] sm:$0xff]  }
 0x36a   : > { %v3289_v7 = vadd.f32 %v3288_v39, %v3201_v33  ;;  %v2140_v36 = vpop.f32.mrb[29].mxu0  ;;  %v2215_v38 = vpack.c.bf16 %v2205_v26, %v2204_v23 }
 0x36b   : > { %v3292_v5 = vadd.f32 %v4473_v16, %v2140_v36  ;;  %v3202_v11 = vpop.f32.mrb[30].mxu0  ;;  %v2214_v40 = vpack.c.bf16 %v2203_v32, %v2202_v46  ;;  %v2793_v46 = vld [vmem:[%s4144_s15 + $0x28] sm:$0xff]   ;;  %v2779_v36 = vunpack.c.l.bf16 %v2794_v18 }
 0x36c   : > { %v2192_v34 = vadd.f32 %v3289_v7, %v4482_v51  ;;  %v3295_v43 = vadd.f32 %v4484_v42, %v3202_v11  ;;  %v2143_v55 = vpop.f32.mrb[31].mxu0  ;;  %v2790_v42 = vld [vmem:[%s4144_s15 + $0x10] sm:$0xff]   ;;  %v2775_v11 = vunpack.c.l.bf16 %v2793_v46 }
 0x36d   : > { %v2190_v59 = vadd.f32 %v3292_v5, %v4482_v51  ;;  %v3298_v1 = vadd.f32 %v4475_v25, %v2143_v55  ;;  %3227 = vmatprep.mubr.bf16.mxu1 %v2214_v40  ;;  %v4522_v25 = vld [vmem:[%s4692_s18] ss:$0 sm:$0xff]  ;;  %v2763_v57 = vunpack.c.l.bf16 %v2790_v42  ;;  %v2764_v58 = vunpack.c.h.bf16 %v2790_v42  ;;  %v2795_v42 = vld [vmem:[%s4144_s15 + $0x38] sm:$0xff]   ;;  %s3691_s18 = scalar_lea.vmem %s3690_s1, 4096 }
 0x36e   : > { %v2193_v39 = vadd.f32 %v3295_v43, %v4482_v51  ;;  %3228 = vmatmul.mubr.bf16.gmra.mrb[76].mxu1 %v2215_v38  ;;  %v2208_v16 = vmax.f32 %v2192_v34, 0.0  ;;  %v2780_v43 = vunpack.c.h.bf16 %v2794_v18  ;;  %p3693_p12 = scmp.lt.s32.totalorder %s3691_s18, %s3685_s2 }
 0x36f   : > { %v2191_v15 = vadd.f32 %v3298_v1, %v4482_v51  ;;  %v2206_v21 = vmax.f32 %v2190_v59, 0.0  ;;  %v2759_v51 = vunpack.c.l.bf16 %v2789_v56  ;;  %v2776_v1 = vunpack.c.h.bf16 %v2793_v46 }
 0x370   : > { %v2209_v49 = vmax.f32 %v2193_v39, 0.0  ;;  %p3694_p4 = por %p3693_p12, %p3692_p8 }
 0x371   : > { %v2207_v37 = vmax.f32 %v2191_v15, 0.0 }
 0x372   : > { %v2217_v50 = vpack.c.bf16 %v2209_v49, %v2208_v16 }
 0x373   : > { %v2216_v53 = vpack.c.bf16 %v2207_v37, %v2206_v21  ;;  %v2796_v37 = vld [vmem:[%s4144_s15 + $0x40] sm:$0xff]   ;;  %s4694_s15 = sld [smem:[#allocation18_spill]] }
 0x375   : > { %3231 = vmatprep.mubr.bf16.mxu1 %v2216_v53 }
 0x376   : > { %3232 = vmatmul.mubr.bf16.gmra.mrb[80].mxu1 %v2217_v50 }
 0x379   : > { %p4696_p5 = scmp.ne.s32.totalorder %s4694_s15, 0 }
 0x37b   : > { %p3687_p13 = pnand %p3686_p9, %p4696_p5 }
 0x37d   : > { %p3688_p6 = pneg %p3687_p13 }
 0x37f   : > { %p3695_p7 = pnand %p3694_p4, %p3688_p6 }
 0x431   : > { %v3221_v60 = vpop.f32.mrb[68].mxu1 }
 0x432   : > { %v2332_v52 = vadd.f32 %v3221_v60, %v4522_v25  ;;  %v2323_v61 = vpop.f32.mrb[69].mxu1 }
 0x433   : > { %v2324_v31 = vadd.f32 %v4522_v25, %v2323_v61  ;;  %v3222_v63 = vpop.f32.mrb[70].mxu1 }
 0x434   : > { %v2424_v54 = vadd.f32 %v2763_v57, %v2332_v52  ;;  %v2335_v62 = vadd.f32 %v3222_v63, %v4522_v25  ;;  %v2326_v3 = vpop.f32.mrb[71].mxu1 }
 0x435   : > { %v2422_v41 = vadd.f32 %v2759_v51, %v2324_v31  ;;  %v2327_v35 = vadd.f32 %v4522_v25, %v2326_v3  ;;  %v2787_v51 = vunpack.c.l.bf16 %v2796_v37  ;;  %v2784_v3 = vunpack.c.h.bf16 %v2795_v42 }
 0x436   : > { %v2440_v45 = vmax.f32 %v2424_v54, 0.0  ;;  %v2425_v10 = vadd.f32 %v2764_v58, %v2335_v62  ;;  %v2783_v58 = vunpack.c.l.bf16 %v2795_v42 }
 0x437   : > { %v2438_v29 = vmax.f32 %v2422_v41, 0.0  ;;  %v2423_v19 = vadd.f32 %v2760_v0, %v2327_v35  ;;  %v2788_v0 = vunpack.c.h.bf16 %v2796_v37 }
 0x438   : > { %2456 = vst [vmem:[%s4291_s8 + $0x10] sm:$0xff] %v2440_v45  ;;  %v2441_v20 = vmax.f32 %v2425_v10, 0.0 }
 0x439   : > { %2454 = vst [vmem:[%s4291_s8] sm:$0xff] %v2438_v29  ;;  %v2439_v24 = vmax.f32 %v2423_v19, 0.0  ;;  %v3225_v27 = vpop.f32.mrb[72].mxu1 }
 0x43a   : > { %2457 = vst [vmem:[%s4291_s8 + $0x18] sm:$0xff] %v2441_v20  ;;  %v2348_v9 = vadd.f32 %v3225_v27, %v4522_v25  ;;  %v2339_v17 = vpop.f32.mrb[73].mxu1 }
 0x43b   : > { %2455 = vst [vmem:[%s4291_s8 + $0x8] sm:$0xff] %v2439_v24  ;;  %v2340_v4 = vadd.f32 %v4522_v25, %v2339_v17  ;;  %v3226_v22 = vpop.f32.mrb[74].mxu1 }
 0x43c   : > { %v2428_v48 = vadd.f32 %v2771_v8, %v2348_v9  ;;  %v2351_v28 = vadd.f32 %v3226_v22, %v4522_v25  ;;  %v2342_v44 = vpop.f32.mrb[75].mxu1 }
 0x43d   : > { %v2426_v30 = vadd.f32 %v2767_v2, %v2340_v4  ;;  %v2343_v14 = vadd.f32 %v4522_v25, %v2342_v44 }
 0x43e   : > { %v2444_v23 = vmax.f32 %v2428_v48, 0.0  ;;  %v2429_v26 = vadd.f32 %v2772_v13, %v2351_v28 }
 0x43f   : > { %v2442_v32 = vmax.f32 %v2426_v30, 0.0  ;;  %v2427_v33 = vadd.f32 %v2768_v12, %v2343_v14 }
 0x440   : > { %2460 = vst [vmem:[%s4291_s8 + $0x30] sm:$0xff] %v2444_v23  ;;  %v2445_v7 = vmax.f32 %v2429_v26, 0.0 }
 0x441   : > { %2458 = vst [vmem:[%s4291_s8 + $0x20] sm:$0xff] %v2442_v32  ;;  %v2443_v38 = vmax.f32 %v2427_v33, 0.0  ;;  %v3229_v5 = vpop.f32.mrb[76].mxu1 }
 0x442   : > { %2461 = vst [vmem:[%s4291_s8 + $0x38] sm:$0xff] %v2445_v7  ;;  %v2364_v40 = vadd.f32 %v3229_v5, %v4522_v25  ;;  %v2355_v34 = vpop.f32.mrb[77].mxu1 }
 0x443   : > { %2459 = vst [vmem:[%s4291_s8 + $0x28] sm:$0xff] %v2443_v38  ;;  %v2356_v55 = vadd.f32 %v4522_v25, %v2355_v34  ;;  %v3230_v59 = vpop.f32.mrb[78].mxu1 }
 0x444   : > { %v2432_v39 = vadd.f32 %v2779_v36, %v2364_v40  ;;  %v2367_v15 = vadd.f32 %v3230_v59, %v4522_v25  ;;  %v2358_v16 = vpop.f32.mrb[79].mxu1 }
 0x445   : > { %v2430_v49 = vadd.f32 %v2775_v11, %v2356_v55  ;;  %v2359_v21 = vadd.f32 %v4522_v25, %v2358_v16 }
 0x446   : > { %v2448_v50 = vmax.f32 %v2432_v39, 0.0  ;;  %v2433_v53 = vadd.f32 %v2780_v43, %v2367_v15 }
 0x447   : > { %v2446_v56 = vmax.f32 %v2430_v49, 0.0  ;;  %v2431_v57 = vadd.f32 %v2776_v1, %v2359_v21 }
 0x448   : > { %2464 = vst [vmem:[%s4291_s8 + $0x50] sm:$0xff] %v2448_v50  ;;  %v2449_v60 = vmax.f32 %v2433_v53, 0.0 }
 0x449   : > { %2462 = vst [vmem:[%s4291_s8 + $0x40] sm:$0xff] %v2446_v56  ;;  %v2447_v52 = vmax.f32 %v2431_v57, 0.0  ;;  %v3233_v61 = vpop.f32.mrb[80].mxu1 }
 0x44a   : > { %2465 = vst [vmem:[%s4291_s8 + $0x58] sm:$0xff] %v2449_v60  ;;  %v2380_v31 = vadd.f32 %v3233_v61, %v4522_v25  ;;  %v2371_v63 = vpop.f32.mrb[81].mxu1 }
 0x44b   : > { %2463 = vst [vmem:[%s4291_s8 + $0x48] sm:$0xff] %v2447_v52  ;;  %v2372_v54 = vadd.f32 %v4522_v25, %v2371_v63  ;;  %v3234_v62 = vpop.f32.mrb[82].mxu1 }
 0x44c   : > { %v2436_v41 = vadd.f32 %v2787_v51, %v2380_v31  ;;  %v2383_v35 = vadd.f32 %v3234_v62, %v4522_v25  ;;  %v2374_v6 = vpop.f32.mrb[83].mxu1 }
 0x44d   : > { %v2434_v45 = vadd.f32 %v2783_v58, %v2372_v54  ;;  %v2375_v10 = vadd.f32 %v4522_v25, %v2374_v6 }
 0x44e   : > { %v2452_v47 = vmax.f32 %v2436_v41, 0.0  ;;  %v2437_v29 = vadd.f32 %v2788_v0, %v2383_v35 }
 0x44f   : > { %v2450_v19 = vmax.f32 %v2434_v45, 0.0  ;;  %v2435_v20 = vadd.f32 %v2784_v3, %v2375_v10 }
 0x450   : > { %2468 = vst [vmem:[%s4291_s8 + $0x70] sm:$0xff] %v2452_v47  ;;  %v2453_v8 = vmax.f32 %v2437_v29, 0.0 }
 0x451   : > { %2466 = vst [vmem:[%s4291_s8 + $0x60] sm:$0xff] %v2450_v19  ;;  %v2451_v25 = vmax.f32 %v2435_v20, 0.0 }
 0x452   : > { %2469 = vst [vmem:[%s4291_s8 + $0x78] sm:$0xff] %v2453_v8 }
 0x453   : > { %2467 = vst [vmem:[%s4291_s8 + $0x68] sm:$0xff] %v2451_v25 }
 0x454   : > { %3698 = shalt.err (!%p3695_p7)
}
 0x455   : > { %s3699_s3 = scalar_lea.hbm %s4565_s12, 2048  ;;  %s3703_s20 = scalar_lea.hbm %s4695_s6, 8192 }
 0x456   : > { %p3700_p3 = scmp.ne.s32.totalorder %s4565_s12, %s3699_s3  ;;  %p3704_p11 = scmp.lt.u32.totalorder %s4565_s12, %s4695_s6 }
 0x457   : > { %p3705_p10 = scmp.lt.u32.totalorder %s3703_s20, %s3699_s3  ;;  %p3707_p9 = scmp.lt.u32.totalorder %s3699_s3, %s4565_s12 }
 0x458   : > { %p3701_p0 = pnand %p3700_p3, %p4696_p5 }
 0x459   : > { %p3706_p2 = por %p3705_p10, %p3704_p11 }
 0x45a   : > { %p3702_p1 = pneg %p3701_p0 }
 0x45b   : > { %p3708_p13 = por %p3707_p9, %p3706_p2 }
 0x45d   : > { %p3709_p6 = pnand %p3708_p13, %p3702_p1 }
 0x45f   : > { %3712 = shalt.err (!%p3709_p6)
}
 0x460   : > { %s3826_s30 = smov 128   ;;  %s3827_s14 = smov 8  }
 0x461   : > { %3348 = dma.vmem_to_hbm [thread:$0]  (%p4696_p5), %s4567_s16, 2048, %s4565_s12, %s4574_s21, %s3826_s30, %s3826_s30, %s3827_s14  }
 0x462 PF: > { %s4697_s4 = sld [smem:[#allocation16_spill]]  ;;  %s4698_s2 = sld [smem:[#allocation19_spill]] }
 0x463   : > { %p3375_p8 = scmp.ge.s32.totalorder %s3815_s11, 2 }
 0x468   : > { %s2502_s24 = sand.u32 1, %s4697_s4   ;;  %p4699_p12 = scmp.ne.s32.totalorder %s4698_s2, 0 }
 0x469   : > { %s2503_s1 = scalar_lea.sflag [#allocation5], %s2502_s24 }
 0x46a   : > { %p3365_p4 = pnand %p3375_p8, %p4699_p12 }
 0x46c   : > { %3770 = dma.done.wait (!%p3365_p4), %s2503_s1, 2048  }
 0x46d   : > { %3772 = vsyncadd (!%p3365_p4), %s2503_s1, 4294965248  ;;  %s25_s11 = sadd.s32 1, %s3815_s11   ;;  %s4700_s24 = smov %s3779_s25 }
 0x46e   : > { %p22_p7 = scmp.ge.s32.totalorder %s25_s11, 6   ;;  %s4701_s25 = smov %s3783_s26 }
 0x46f   : > { %s4702_s26 = smov %s4075_s27  ;;  %s4703_s27 = smov %s3791_s28 }
 0x470   : > { %s4704_s28 = smov %s3795_s29  ;;  %s4705_s29 = smov %s4070_s7 }
 0x471   : > { %s4706_s30 = smov %s3807_s9  ;;  %s4707_s8 = smov %s3811_s10 }
 0x472   : > { %s4708_s9 = smov %s4711_s17  ;;  %s4709_s10 = smov %s4715_s22 }
 0x473   :  { %24 = sbr.rel (!%p22_p7) target bundleno = 18 (0x12), region = 120 }
 0x47a   :  { %2508 = vsyncpa [#allocation4], 1 }
 0x47b   :  { %2510 = vsyncpa [#allocation4 + $0x1], 1 }
 0x47c   :  { %2511 = vsyncpa [#allocation7], 1 }
 0x47d   :  { %2512 = vsyncpa [#allocation10], 1 }
 0x47e   :  { %2513 = vsyncpa [#allocation5], 1 }
 0x47f   :  { %2515 = vsyncpa [#allocation5 + $0x1], 1 }

</bundles_post_ra>
